<compile_context>
chip_gen: v7x
topology: tpu7x:2x2x1
jax: 0.10.0
libtpu: 0.0.40
codegen_flags: <defaults>
</compile_context>

<pallas_src>
import jax
import jax.numpy as jnp
from jax.experimental import pallas as pl
from jax.experimental.pallas import tpu as pltpu

IN_DIM = 28 * 28          # 784
K_PAD = 896               # 784 padded up to a multiple of 128 (layer 0 only)
HIDDEN = 512
OUT_DIM = 10
N_LAST_PAD = 128          # last layer's 10 outputs padded to one lane tile


def _round_up(x, m):
    return (x + m - 1) // m * m


# ----------------------------------------------------------------------------
# Fused Pallas kernel: one grid step == one Linear layer of the MLP.
# ----------------------------------------------------------------------------
def _fused_mlp_kernel(x_hbm_ref, w0_ref, wh_ref, wl_ref, b_ref, o_ref, act_ref):
    # x_hbm_ref : (B, K_PAD)          bf16  flattened input, left in HBM (pl.ANY)
    # w0_ref    : (K_PAD, HIDDEN)     bf16  layer-0 weight (fetched once)
    # wh_ref    : (HIDDEN, HIDDEN)    bf16  hidden-layer weight, streamed per layer
    # wl_ref    : (HIDDEN, N_LAST_PAD)bf16  last-layer weight (fetched once)
    # b_ref     : (1, HIDDEN)         f32   this layer's bias, streamed per layer
    # o_ref     : (B, N_LAST_PAD)     f32   final logits (written on the last layer)
    # act_ref   : (B, K_PAD)          bf16  VMEM-resident activation (never in HBM)
    layer = pl.program_id(0)
    last = pl.num_programs(0) - 1

    # ---- Layer 0: 784(->896) -> 512, ReLU ------------------------------------
    @pl.when(layer == 0)
    def _():
        # One-shot HBM -> VMEM copy of the flattened, K-padded input; the
        # activation lives only in VMEM for the rest of the network.
        pltpu.sync_copy(x_hbm_ref, act_ref)
        y = jnp.dot(act_ref[...], w0_ref[...], preferred_element_type=jnp.float32)
        y = y + b_ref[...]
        act_ref[:, :HIDDEN] = jnp.maximum(y, 0.0).astype(act_ref.dtype)

    # ---- Hidden layers 1..L-2: 512 -> 512, ReLU (no K padding) ---------------
    @pl.when(jnp.logical_and(layer > 0, layer < last))
    def _():
        y = jnp.dot(act_ref[:, :HIDDEN], wh_ref[...],
                    preferred_element_type=jnp.float32)
        y = y + b_ref[...]
        act_ref[:, :HIDDEN] = jnp.maximum(y, 0.0).astype(act_ref.dtype)

    # ---- Last layer: 512 -> 10(->128), no ReLU, lane-dense store --------------
    @pl.when(layer == last)
    def _():
        y = jnp.dot(act_ref[:, :HIDDEN], wl_ref[...],
                    preferred_element_type=jnp.float32)
        o_ref[...] = y + b_ref[:, :N_LAST_PAD]


# ----------------------------------------------------------------------------
# Parameter init (PyTorch nn.Linear-style)
# ----------------------------------------------------------------------------
def init_params(key, depth: int):
    """dims = [784] + [512]*depth + [10]; layer i: Linear(dims[i] -> dims[i+1])."""
    dims = [IN_DIM] + [HIDDEN] * depth + [OUT_DIM]
    params = []
    for i in range(1, len(dims)):
        fan_in, fan_out = dims[i - 1], dims[i]
        key, kw, kb = jax.random.split(key, 3)
        bound = 1.0 / jnp.sqrt(float(fan_in))
        # Stored already transposed to (in, out) for the kernel.
        w_t = jax.random.uniform(kw, (fan_in, fan_out), jnp.float32,
                                 minval=-bound, maxval=bound)
        b = jax.random.uniform(kb, (fan_out,), jnp.float32,
                               minval=-bound, maxval=bound)
        params.append((w_t, b))
    return params


def pack_params(params):
    """Pack per-layer params into kernel-friendly tensors:
         w0      : (K_PAD, HIDDEN)                 bf16  (784->512, K zero-padded)
         wh      : (max(L-2,1), HIDDEN, HIDDEN)    bf16  (hidden layers, unpadded)
         wl      : (HIDDEN, N_LAST_PAD)            bf16  (512->10, N zero-padded)
         b_stack : (L, 1, HIDDEN)                  f32   (all biases, zero-padded)
    """
    L = len(params)
    assert L >= 2, "This packing assumes depth >= 1 (at least one ReLU layer)."

    w0_t, _ = params[0]
    w0 = (jnp.zeros((K_PAD, HIDDEN), jnp.float32)
          .at[:IN_DIM, :HIDDEN].set(w0_t).astype(jnp.bfloat16))

    n_hid = L - 2
    if n_hid > 0:
        wh = jnp.stack([params[i][0] for i in range(1, L - 1)], axis=0)
        wh = wh.astype(jnp.bfloat16)
    else:
        # Dummy block so the streamed input is non-empty; never read.
        wh = jnp.zeros((1, HIDDEN, HIDDEN), jnp.bfloat16)

    wl_t, _ = params[-1]
    wl = (jnp.zeros((HIDDEN, N_LAST_PAD), jnp.float32)
          .at[:, :OUT_DIM].set(wl_t).astype(jnp.bfloat16))

    bs = []
    for (_, b) in params:
        bs.append(jnp.zeros((1, HIDDEN), jnp.float32).at[0, :b.shape[0]].set(b))
    b_stack = jnp.stack(bs, axis=0)

    return w0, wh, wl, b_stack


# ----------------------------------------------------------------------------
# Forward pass: single fused pallas_call over a layer grid
# ----------------------------------------------------------------------------
def forward(packed_params, x_nchw):
    w0, wh, wl, b_stack = packed_params
    L = b_stack.shape[0]             # total linear layers = depth + 1
    n_hid_blocks = wh.shape[0]
    B = x_nchw.shape[0]
    # Pad batch to a multiple of 16 (bf16 vreg is 16x128 sublanes).
    B_pad = max(_round_up(B, 16), 16)

    # nn.Flatten(): (B, 1, 28, 28) -> (B, 784); pad batch (sublanes) + K (lanes).
    x = x_nchw.reshape(B, -1)
    x = jnp.zeros((B_pad, K_PAD), jnp.float32).at[:B, :IN_DIM].set(x)
    x = x.astype(jnp.bfloat16)

    def hid_idx(l):
        # Hidden weight block for layer l is block (l-1), clamped so layer 0 /
        # the last layer reuse an already-resident block (no extra DMA).
        return (jnp.maximum(jnp.minimum(l - 1, n_hid_blocks - 1), 0), 0, 0)

    out = pl.pallas_call(
        _fused_mlp_kernel,
        out_shape=jax.ShapeDtypeStruct((B_pad, N_LAST_PAD), jnp.float32),
        grid_spec=pltpu.PrefetchScalarGridSpec(
            num_scalar_prefetch=0,
            grid=(L,),  # one grid step per layer
            in_specs=[
                # Flattened input: stays in HBM, copied into act_ref at layer 0.
                pl.BlockSpec(memory_space=pl.ANY),
                # Layer-0 weight: constant block index -> DMA'd once.
                pl.BlockSpec((K_PAD, HIDDEN), lambda l: (0, 0)),
                # Hidden weights: streamed / double-buffered over the layer axis.
                pl.BlockSpec((None, HIDDEN, HIDDEN), hid_idx),
                # Last-layer weight: constant block index -> DMA'd once.
                pl.BlockSpec((HIDDEN, N_LAST_PAD), lambda l: (0, 0)),
                # Biases: streamed alongside (tiny).
                pl.BlockSpec((None, 1, HIDDEN), lambda l: (l, 0, 0)),
            ],
            out_specs=pl.BlockSpec((B_pad, N_LAST_PAD), lambda l: (0, 0)),
            scratch_shapes=[pltpu.VMEM((B_pad, K_PAD), jnp.bfloat16)],
        ),
        compiler_params=pltpu.CompilerParams(
            dimension_semantics=("arbitrary",),  # layer axis is sequential
        ),
    )(x, w0, wh, wl, b_stack)

    # Strip batch + lane padding: logits are the first 10 columns.
    return out[:B, :OUT_DIM]


# ----------------------------------------------------------------------------
# Pure-JAX reference with identical numerics (bf16 weights/acts, f32 accum)
# ----------------------------------------------------------------------------
def forward_ref(params, x_nchw):
    B = x_nchw.shape[0]
    x = x_nchw.reshape(B, -1).astype(jnp.bfloat16)
    y = None
    n = len(params)
    for i, (w_t, b) in enumerate(params):
        y = jnp.dot(x, w_t.astype(jnp.bfloat16),
                    preferred_element_type=jnp.float32) + b
        if i < n - 1:
            x = jnp.maximum(y, 0.0).astype(jnp.bfloat16)
    return y


if __name__ == "__main__":
    key = jax.random.PRNGKey(0)
    k_params, k_x = jax.random.split(key)

    DEPTH = 2   # layer widths (784, 512, ..., 10) are fixed by the module
    BATCH = 8

    params = init_params(k_params, DEPTH)
    packed = pack_params(params)

    # MNIST-like NCHW input: (B, 1, 28, 28)
    x = jax.random.normal(k_x, (BATCH, 1, 28, 28), dtype=jnp.float32)

    out = jax.block_until_ready(forward(packed, x))
    assert out.shape == (BATCH, OUT_DIM), out.shape

    ref = jax.block_until_ready(forward_ref(params, x))
    assert jnp.allclose(out, ref, atol=1e-2, rtol=1e-2), float(
        jnp.max(jnp.abs(out - ref))
    )

    print("KERNEL_OK")
</pallas_src>

<mosaic_0001>
module attributes {stable_mosaic.version = 11 : i64} {
  func.func @_fused_mlp_kernel(%arg0: i32, %arg1: memref<16x896xbf16, #tpu.memory_space<any>>, %arg2: memref<896x512xbf16, #tpu.memory_space<vmem>>, %arg3: memref<1x512x512xbf16, #tpu.memory_space<vmem>>, %arg4: memref<512x128xbf16, #tpu.memory_space<vmem>>, %arg5: memref<1x1x512xf32, #tpu.memory_space<vmem>>, %arg6: memref<16x128xf32, #tpu.memory_space<vmem>>, %arg7: memref<16x896xbf16, #tpu.memory_space<vmem>>) attributes {dimension_semantics = [#tpu.dimension_semantics<arbitrary>], iteration_bounds = array<i64: 3>, scalar_prefetch = 0 : i64, scratch_operands = 1 : i64, tpu.core_type = #tpu.core_type<tc>, window_params = [{}, {pipeline_mode = #tpu.pipeline_mode<synchronous>, transform_indices = @transform_1, window_bounds = array<i64: 896, 512>}, {transform_indices = @transform_2, window_bounds = array<i64: 1, 512, 512>}, {pipeline_mode = #tpu.pipeline_mode<synchronous>, transform_indices = @transform_3, window_bounds = array<i64: 512, 128>}, {transform_indices = @transform_4, window_bounds = array<i64: 1, 1, 512>}, {pipeline_mode = #tpu.pipeline_mode<synchronous>, transform_indices = @transform_5, window_bounds = array<i64: 16, 128>}]} {
    %c0_i32 = arith.constant 0 : i32
    %0 = arith.cmpi eq, %arg0, %c0_i32 : i32
    %1 = arith.extui %0 : i1 to i32
    %c0_i32_0 = arith.constant 0 : i32
    %2 = arith.cmpi ne, %1, %c0_i32_0 : i32
    scf.if %2 {
      "tpu.region"() ({
        %22 = tpu.sem_alloc : memref<!tpu.dma_semaphore, #tpu.memory_space<semaphore_mem>>
        tpu.enqueue_dma source(%arg1 : memref<16x896xbf16, #tpu.memory_space<any>>) target(%arg7 : memref<16x896xbf16, #tpu.memory_space<vmem>>) target_semaphore(%22 : memref<!tpu.dma_semaphore, #tpu.memory_space<semaphore_mem>>)
        tpu.wait_dma2 semaphore(%22 : memref<!tpu.dma_semaphore, #tpu.memory_space<semaphore_mem>>) src(%arg1 : memref<16x896xbf16, #tpu.memory_space<any>>) dst(%arg7 : memref<16x896xbf16, #tpu.memory_space<vmem>>)
        tpu.yield
      }) : () -> ()
      %c0 = arith.constant 0 : index
      %c0_5 = arith.constant 0 : index
      %11 = vector.load %arg7[%c0, %c0_5] : memref<16x896xbf16, #tpu.memory_space<vmem>>, vector<16x896xbf16>
      %c0_6 = arith.constant 0 : index
      %c0_7 = arith.constant 0 : index
      %12 = vector.load %arg2[%c0_6, %c0_7] : memref<896x512xbf16, #tpu.memory_space<vmem>>, vector<896x512xbf16>
      %cst = arith.constant dense<0.000000e+00> : vector<16x512xf32>
      %13 = tpu.matmul %11, %12, %cst {dimension_numbers = #tpu.dot_dimension_numbers<[1], [0], [0], [1], [0, 0, 1, 1], [], []>} : vector<16x896xbf16>, vector<896x512xbf16>, vector<16x512xf32> -> vector<16x512xf32>
      %c0_8 = arith.constant 0 : index
      %c0_9 = arith.constant 0 : index
      %c0_10 = arith.constant 0 : index
      %14 = vector.load %arg5[%c0_8, %c0_9, %c0_10] : memref<1x1x512xf32, #tpu.memory_space<vmem>>, vector<1x1x512xf32>
      %15 = vector.shape_cast %14 : vector<1x1x512xf32> to vector<1x512xf32>
      %16 = vector.broadcast %15 : vector<1x512xf32> to vector<16x512xf32>
      %17 = arith.addf %13, %16 : vector<16x512xf32>
      %cst_11 = arith.constant 0.000000e+00 : f32
      %18 = vector.broadcast %cst_11 : f32 to vector<16x512xf32>
      %19 = arith.maximumf %17, %18 : vector<16x512xf32>
      %20 = arith.truncf %19 : vector<16x512xf32> to vector<16x512xbf16>
      %c0_12 = arith.constant 0 : index
      %c0_13 = arith.constant 0 : index
      %21 = vector.load %arg7[%c0_12, %c0_13] : memref<16x896xbf16, #tpu.memory_space<vmem>>, vector<16x512xbf16>
      tpu.vector_store %arg7[%c0_12, %c0_13], %20 {strides = array<i32>} : memref<16x896xbf16, #tpu.memory_space<vmem>>, vector<16x512xbf16>,
    } else {
    }
    %c0_i32_1 = arith.constant 0 : i32
    %3 = arith.cmpi sgt, %arg0, %c0_i32_1 : i32
    %c2_i32 = arith.constant 2 : i32
    %4 = arith.cmpi slt, %arg0, %c2_i32 : i32
    %5 = arith.andi %3, %4 : i1
    %6 = arith.extui %5 : i1 to i32
    %c0_i32_2 = arith.constant 0 : i32
    %7 = arith.cmpi ne, %6, %c0_i32_2 : i32
    scf.if %7 {
      %c0 = arith.constant 0 : index
      %c0_5 = arith.constant 0 : index
      %11 = vector.load %arg7[%c0, %c0_5] : memref<16x896xbf16, #tpu.memory_space<vmem>>, vector<16x512xbf16>
      %c0_6 = arith.constant 0 : index
      %c0_7 = arith.constant 0 : index
      %c0_8 = arith.constant 0 : index
      %12 = vector.load %arg3[%c0_6, %c0_7, %c0_8] : memref<1x512x512xbf16, #tpu.memory_space<vmem>>, vector<1x512x512xbf16>
      %13 = vector.shape_cast %12 : vector<1x512x512xbf16> to vector<512x512xbf16>
      %cst = arith.constant dense<0.000000e+00> : vector<16x512xf32>
      %14 = tpu.matmul %11, %13, %cst {dimension_numbers = #tpu.dot_dimension_numbers<[1], [0], [0], [1], [0, 0, 1, 1], [], []>} : vector<16x512xbf16>, vector<512x512xbf16>, vector<16x512xf32> -> vector<16x512xf32>
      %c0_9 = arith.constant 0 : index
      %c0_10 = arith.constant 0 : index
      %c0_11 = arith.constant 0 : index
      %15 = vector.load %arg5[%c0_9, %c0_10, %c0_11] : memref<1x1x512xf32, #tpu.memory_space<vmem>>, vector<1x1x512xf32>
      %16 = vector.shape_cast %15 : vector<1x1x512xf32> to vector<1x512xf32>
      %17 = vector.broadcast %16 : vector<1x512xf32> to vector<16x512xf32>
      %18 = arith.addf %14, %17 : vector<16x512xf32>
      %cst_12 = arith.constant 0.000000e+00 : f32
      %19 = vector.broadcast %cst_12 : f32 to vector<16x512xf32>
      %20 = arith.maximumf %18, %19 : vector<16x512xf32>
      %21 = arith.truncf %20 : vector<16x512xf32> to vector<16x512xbf16>
      %c0_13 = arith.constant 0 : index
      %c0_14 = arith.constant 0 : index
      %22 = vector.load %arg7[%c0_13, %c0_14] : memref<16x896xbf16, #tpu.memory_space<vmem>>, vector<16x512xbf16>
      tpu.vector_store %arg7[%c0_13, %c0_14], %21 {strides = array<i32>} : memref<16x896xbf16, #tpu.memory_space<vmem>>, vector<16x512xbf16>,
    } else {
    }
    %c2_i32_3 = arith.constant 2 : i32
    %8 = arith.cmpi eq, %arg0, %c2_i32_3 : i32
    %9 = arith.extui %8 : i1 to i32
    %c0_i32_4 = arith.constant 0 : i32
    %10 = arith.cmpi ne, %9, %c0_i32_4 : i32
    scf.if %10 {
      %c0 = arith.constant 0 : index
      %c0_5 = arith.constant 0 : index
      %11 = vector.load %arg7[%c0, %c0_5] : memref<16x896xbf16, #tpu.memory_space<vmem>>, vector<16x512xbf16>
      %c0_6 = arith.constant 0 : index
      %c0_7 = arith.constant 0 : index
      %12 = vector.load %arg4[%c0_6, %c0_7] : memref<512x128xbf16, #tpu.memory_space<vmem>>, vector<512x128xbf16>
      %cst = arith.constant dense<0.000000e+00> : vector<16x128xf32>
      %13 = tpu.matmul %11, %12, %cst {dimension_numbers = #tpu.dot_dimension_numbers<[1], [0], [0], [1], [0, 0, 1, 1], [], []>} : vector<16x512xbf16>, vector<512x128xbf16>, vector<16x128xf32> -> vector<16x128xf32>
      %c0_8 = arith.constant 0 : index
      %c0_9 = arith.constant 0 : index
      %c0_10 = arith.constant 0 : index
      %14 = vector.load %arg5[%c0_8, %c0_9, %c0_10] : memref<1x1x512xf32, #tpu.memory_space<vmem>>, vector<1x1x128xf32>
      %15 = vector.shape_cast %14 : vector<1x1x128xf32> to vector<1x128xf32>
      %16 = vector.broadcast %15 : vector<1x128xf32> to vector<16x128xf32>
      %17 = arith.addf %13, %16 : vector<16x128xf32>
      %c0_11 = arith.constant 0 : index
      %c0_12 = arith.constant 0 : index
      %18 = vector.load %arg6[%c0_11, %c0_12] : memref<16x128xf32, #tpu.memory_space<vmem>>, vector<16x128xf32>
      tpu.vector_store %arg6[%c0_11, %c0_12], %17 {strides = array<i32>} : memref<16x128xf32, #tpu.memory_space<vmem>>, vector<16x128xf32>,
    } else {
    }
    return
  }
  func.func @transform_1(%arg0: i32) -> (i32, i32) {
    %c0_i32 = arith.constant 0 : i32
    %c0_i32_0 = arith.constant 0 : i32
    %c0_i32_1 = arith.constant 0 : i32
    return %c0_i32, %c0_i32_0 : i32, i32
  }
  func.func @transform_2(%arg0: i32) -> (i32, i32, i32) {
    %c1_i32 = arith.constant 1 : i32
    %0 = arith.subi %arg0, %c1_i32 : i32
    %c0_i32 = arith.constant 0 : i32
    %1 = arith.minsi %0, %c0_i32 : i32
    %c0_i32_0 = arith.constant 0 : i32
    %2 = arith.maxsi %1, %c0_i32_0 : i32
    %c0_i32_1 = arith.constant 0 : i32
    %c0_i32_2 = arith.constant 0 : i32
    %c0_i32_3 = arith.constant 0 : i32
    return %2, %c0_i32_1, %c0_i32_2 : i32, i32, i32
  }
  func.func @transform_3(%arg0: i32) -> (i32, i32) {
    %c0_i32 = arith.constant 0 : i32
    %c0_i32_0 = arith.constant 0 : i32
    %c0_i32_1 = arith.constant 0 : i32
    return %c0_i32, %c0_i32_0 : i32, i32
  }
  func.func @transform_4(%arg0: i32) -> (i32, i32, i32) {
    %c0_i32 = arith.constant 0 : i32
    %c0_i32_0 = arith.constant 0 : i32
    %c0_i32_1 = arith.constant 0 : i32
    return %arg0, %c0_i32, %c0_i32_0 : i32, i32, i32
  }
  func.func @transform_5(%arg0: i32) -> (i32, i32) {
    %c0_i32 = arith.constant 0 : i32
    %c0_i32_0 = arith.constant 0 : i32
    %c0_i32_1 = arith.constant 0 : i32
    return %c0_i32, %c0_i32_0 : i32, i32
  }
}

</mosaic_0001>

<bundles_post_ra>
// kernel: tpu_custom_call.1
= control target key start
LH: loop header
LB: loop body
LE: loop exit
PB: predicated region body
PF: predicated region fallthrough
CT: control target
= control target key end

     0   :  { %10 = vsyncpa [#allocation4], 0  ;;  %s4972_s0 = inlined_call_operand.hbm [shape: bf16[16,896], index: 0, kind: input, shape index: {}]   ;;  %s4973_s1 = inlined_call_operand.hbm [shape: bf16[896,512], index: 1, kind: input, shape index: {}]   ;;  %s4974_s2 = inlined_call_operand.hbm [shape: bf16[1,512,512], index: 2, kind: input, shape index: {}]   ;;  %s4975_s3 = inlined_call_operand.hbm [shape: bf16[512,128], index: 3, kind: input, shape index: {}]   ;;  %s4976_s4 = inlined_call_operand.vmem [shape: f32[3,1,512], index: 4, kind: input, shape index: {}]   ;;  %s4977_s5 = inlined_call_operand.hbm [shape: f32[16,128], index: 5, kind: output, shape index: {}]  }
   0x1   :  { %11 = vsyncpa [#allocation7], 0 }
   0x2   :  { %13 = vsyncpa [#allocation7 + $0x1], 0 }
   0x3   :  { %14 = vsyncpa [#allocation5], 0  ;;  %s4797_s18 = smov 0  }
   0x4 LB: > { %s4748_s19 = smov [#allocation8]   ;;  %s4803_s21 = sadd.s32 4294967295, %s4746_s18   ;;  %s4746_s18 = sphi %s4797_s18, %s20_s18  }
   0x5   : > { %s175_s20 = sshll.u32 %s4748_s19, 4  ;;  %p3490_p0 = scmp.ge.s32.totalorder %s4746_s18, 1  ;;  %s4809_s20 = int_to_ptr.vmem [resolvable:$true] %s175_s20 }
   0x6   : > { %p4978_p1 = scmp.eq.s32.totalorder %s4803_s21, 0  ;;  %p150_p2 = scmp.lt.s32.totalorder %s4746_s18, 4 }
   0x7   : > { %s4749_s23 = smov [#allocation3]   ;;  %p66_p7 = scmp.eq.s32.totalorder %s4746_s18, 0 }
   0x8   : > { %p4811_p4 = pnand %p3490_p0, %p150_p2  ;;  %s162_s24 = sshll.u32 %s4749_s23, 4  ;;  %s4823_s24 = int_to_ptr.vmem [resolvable:$true] %s162_s24 }
   0x9   : > { %s4612_s28 = scalar_lea.hbm %s4975_s3, 4096 }
   0xa   : > { %s4980_s22 = scalar_select %p4811_p4, 1, 0 }
   0xb   : > { %p4007_p5 = pneg %p4811_p4  ;;  %p4613_p9 = scmp.ne.s32.totalorder %s4975_s3, %s4612_s28 }
   0xc   : > { %p4619_p13 = scmp.lt.u32.totalorder %s4612_s28, %s4975_s3 }
   0xd   : > { %p4819_p6 = pnand %p4007_p5, %p4978_p1 }
   0xf   : > { %p4614_p10 = pneg %p4819_p6 }
  0x11   : > { %p4615_p11 = pnand %p4614_p10, %p4613_p9 }
  0x13   : > { %p4616_p12 = pneg %p4615_p11 }
  0x15   : > { %p4621_p0 = pnand %p4619_p13, %p4616_p12 }
  0x17   : > { %4624 = shalt.err (!%p4621_p0)
}
  0x18   : > { %s4625_s8 = scalar_lea.vmem %s4809_s20, 4096  ;;  %p4633_p1 = scmp.lt.s32.totalorder %s4809_s20, %s4809_s20 }
  0x19   : > { %p4626_p2 = scmp.ne.s32.totalorder %s4809_s20, %s4625_s8  ;;  %p4634_p9 = scmp.lt.s32.totalorder %s4625_s8, %s4625_s8 }
  0x1b   : > { %p4628_p5 = pnand %p4626_p2, %p4614_p10  ;;  %p4635_p11 = por %p4634_p9, %p4633_p1 }
  0x1d   : > { %p4629_p3 = pneg %p4628_p5 }
  0x1f   : > { %p4636_p8 = pnand %p4635_p11, %p4629_p3 }
  0x21   : > { %4639 = shalt.err (!%p4636_p8)
}
  0x22   : > { %s4750_s9 = smov 64   ;;  %s4751_s10 = smov 4  }
  0x23   : > { %4013 = dma.hbm_to_vmem [thread:$0]  (!%p4819_p6), %s4975_s3, 4096, %s4809_s20, [#allocation7], %s4750_s9, %s4750_s9, %s4751_s10  }
  0x24   : > { %s4640_s15 = scalar_lea.hbm %s4973_s1, 28672 }
  0x25   : > { %p4641_p1 = scmp.ne.s32.totalorder %s4973_s1, %s4640_s15  ;;  %p4647_p12 = scmp.lt.u32.totalorder %s4640_s15, %s4973_s1 }
  0x27   : > { %p4643_p3 = pnand %p4641_p1, %p4614_p10 }
  0x29   : > { %p4644_p8 = pneg %p4643_p3 }
  0x2b   : > { %p4649_p13 = pnand %p4647_p12, %p4644_p8 }
  0x2d   : > { %4652 = shalt.err (!%p4649_p13)
}
  0x2e   : > { %s4653_s20 = scalar_lea.vmem %s4823_s24, 28672  ;;  %p4661_p9 = scmp.lt.s32.totalorder %s4823_s24, %s4823_s24 }
  0x2f   : > { %p4654_p0 = scmp.ne.s32.totalorder %s4823_s24, %s4653_s20  ;;  %p4662_p11 = scmp.lt.s32.totalorder %s4653_s20, %s4653_s20 }
  0x31   : > { %p4656_p2 = pnand %p4654_p0, %p4614_p10  ;;  %p4663_p1 = por %p4662_p11, %p4661_p9 }
  0x33   : > { %p4657_p5 = pneg %p4656_p2 }
  0x35   : > { %p4664_p3 = pnand %p4663_p1, %p4657_p5 }
  0x37   : > { %4667 = shalt.err (!%p4664_p3)
}
  0x38   : > { %s4752_s26 = smov 256   ;;  %s4753_s27 = smov 16  }
  0x39   : > { %4010 = dma.hbm_to_vmem [thread:$0]  (!%p4819_p6), %s4973_s1, 28672, %s4823_s24, [#allocation4], %s4752_s26, %s4752_s26, %s4753_s27  }
  0x3a   : > { %s189_s30 = sand.u32 1, %s4746_s18   ;;  %s4754_s6 = smov [#allocation6]  }
  0x3b   : > { %s205_s7 = sshll.u32 %s4754_s6, 4  ;;  %p4982_p10 = scmp.lt.s32.totalorder %s4746_s18, 3  ;;  %s206_s7 = int_to_ptr.vmem [resolvable:$true] %s205_s7 }
  0x3c   : > { %s190_s9 = scalar_lea.sflag [#allocation7], %s189_s30  ;;  %s4668_s11 = scalar_lea.hbm %s4974_s2, 16384 }
  0x3d   : > { %p4887_p8 = pnand %p4982_p10, %p66_p7  ;;  %p4669_p6 = scmp.ne.s32.totalorder %s4974_s2, %s4668_s11 }
  0x3e   : > { %p4675_p7 = scmp.lt.u32.totalorder %s4668_s11, %s4974_s2 }
  0x3f   : > { %p4670_p12 = pneg %p4887_p8 }
  0x41   : > { %p4671_p13 = pnand %p4670_p12, %p4669_p6 }
  0x43   : > { %p4672_p0 = pneg %p4671_p13 }
  0x45   : > { %p4677_p2 = pnand %p4675_p7, %p4672_p0 }
  0x47   : > { %4680 = shalt.err (!%p4677_p2)
}
  0x48   : > { %s4681_s15 = scalar_lea.vmem %s206_s7, 16384  ;;  %s4688_s16 = scalar_lea.vmem %s206_s7, 32768 }
  0x49   : > { %p4682_p5 = scmp.ne.s32.totalorder %s206_s7, %s4681_s15  ;;  %p4689_p1 = scmp.lt.s32.totalorder %s206_s7, %s206_s7 }
  0x4a   : > { %p4690_p3 = scmp.lt.s32.totalorder %s4688_s16, %s4681_s15 }
  0x4b   : > { %p4684_p9 = pnand %p4682_p5, %p4670_p12 }
  0x4c   : > { %p4691_p10 = por %p4690_p3, %p4689_p1 }
  0x4d   : > { %p4685_p11 = pneg %p4684_p9 }
  0x4f   : > { %p4692_p4 = pnand %p4691_p10, %p4685_p11 }
  0x51   : > { %4695 = shalt.err (!%p4692_p4)
}
  0x52   : > { %4017 = dma.hbm_to_vmem [thread:$0]  (!%p4887_p8), %s4974_s2, 16384, %s206_s7, %s190_s9, %s4752_s26, %s4752_s26, %s4753_s27  }
  0x53   : > { %p4984_p6 = scmp.ne.s32.totalorder %s4980_s22, 0 }
  0x54   : > { %p4985_p12 = scmp.eq.s32.totalorder (!%p4984_p6), %s4803_s21, 0 }
  0x55   : > { %224 = sbr.rel (%p4984_p6) target bundleno = 1205 (0x4b5), region = 36 }
  0x5c   : > { %4727 = dma.done.wait (%p4985_p12), [#allocation4], 28672   ;;  %p4986_p13 = pmov %p4985_p12 }
  0x5d   : > { %s230_s23 = sand.u32 1, %s4803_s21   ;;  %p4987_p4 = pmov %p4985_p12 }
  0x5e   : > { %4729 = vsyncadd (%p4986_p13), [#allocation4], 4294938624  ;;  %s231_s20 = scalar_lea.sflag [#allocation7], %s230_s23 }
  0x5f   : > { %4731 = dma.done.wait (%p4987_p4), %s231_s20, 16384   ;;  %p4988_p0 = pmov %p4987_p4 }
  0x61   : > { %4733 = vsyncadd (%p4988_p0), %s231_s20, 4294950912  ;;  %p4989_p8 = pmov %p4988_p0 }
  0x62   : > { %p4990_p7 = pmov %p4988_p0 }
  0x63   : > { %4735 = dma.done.wait (%p4989_p8), [#allocation7], 4096  }
  0x64   : > { %4737 = vsyncadd (%p4990_p7), [#allocation7], 4294963200  ;;  %p267_p2 = scmp.lt.s32.totalorder %s4803_s21, 2  ;;  %p4991_p5 = scmp.ne.s32.totalorder %s4803_s21, 0 }
  0x66   : > { %s268_s22 = scalar_select %p267_p2, %s4803_s21, 2 }
  0x67   : > { %275 = sbr.rel (%p4991_p5) target bundleno = 568 (0x238), region = 52 }
  0x68   : > { %s3507_s26 = sshll.u32 %s268_s22, 2 }
  0x69   : > { %s4932_s29 = scalar_lea.vmem %s4976_s4, %s3507_s26 }
  0x6e   : > { %s280_s30 = sld [smem:[#allocation0]]   ;;  %s4755_s6 = smov [#allocation2]  }
  0x6f   : > { %s288_s7 = sshll.u32 %s4755_s6, 4  ;;  %s4756_s8 = smov 64   ;;  %s289_s7 = int_to_ptr.vmem [resolvable:$true] %s288_s7 }
  0x70   : > { %292 = sst [smem:[#allocation12]] %s4756_s8  ;;  %s4757_s9 = smov 128  }
  0x71   : > { %294 = sst [smem:[#allocation12 + $0x1]] %s4757_s9  ;;  %s4758_s25 = smov 2  }
  0x72   : > { %296 = sst [smem:[#allocation12 + $0x2]] %s4758_s25  ;;  %s4759_s11 = smov 448  }
  0x73   : > { %298 = sst [smem:[#allocation12 + $0x3]] %s4759_s11  ;;  %s4760_s13 = smov 4  }
  0x74   : > { %s3509_s10 = sshll.u32 %s280_s30, 26  ;;  %300 = sst [smem:[#allocation12 + $0x4]] %s4756_s8 }
  0x75   : > { %s3510_s12 = sadd.s32 134217728, %s3509_s10  ;;  %302 = sst [smem:[#allocation12 + $0x5]] %s4760_s13 }
  0x76   : > { %s4761_s24 = smov [#allocation10]   ;;  %s4762_s14 = smov [#allocation11]  }
  0x77   : > { %304 = dma.general %s4972_s0, 896, %s289_s7, %s4761_s24, %s4762_s14, [#allocation12], %s3510_s12, 0  }
  0x78   : > { %4738 = dma.done.wait [#allocation10], 896 }
  0x79   : > { %4739 = vsyncadd [#allocation10], 4294966400  ;;  %v4052_v0 = vld [vmem:[#allocation3 + $0x4] ss:$16 sps:$4 sm:$0xff]   ;;  %v4054_v1 = vld [vmem:[#allocation3 + $0xc] ss:$16 sps:$4 sm:$0xff]  }
  0x7a   : > { %1682 = vmatprep.subr.bf16.mxu0 %v4052_v0  ;;  %v4056_v2 = vld [vmem:[#allocation3] ss:$16 sps:$4 sm:$0xff]   ;;  %v4057_v3 = vld [vmem:[#allocation3 + $0x8] ss:$16 sps:$4 sm:$0xff]   ;;  %1854 = vmatprep.subr.bf16.mxu1 %v4054_v1  ;;  %v4058_v4 = vld [vmem:[#allocation3 + $0x24] ss:$16 sps:$4 sm:$0xff]  }
  0x7b   : > { %1683 = vmatpush1.bf16.msra.mxu0 %v4056_v2  ;;  %1855 = vmatpush1.bf16.msra.mxu1 %v4057_v3  ;;  %v4060_v5 = vld [vmem:[#allocation3 + $0x2c] ss:$16 sps:$4 sm:$0xff]   ;;  %v4062_v6 = vld [vmem:[#allocation3 + $0x20] ss:$16 sps:$4 sm:$0xff]   ;;  %v4063_v7 = vld [vmem:[#allocation3 + $0x28] ss:$16 sps:$4 sm:$0xff]  }
  0x7c   : > { %1684 = vmatprep.subr.bf16.mxu0 %v4058_v4  ;;  %1856 = vmatprep.subr.bf16.mxu1 %v4060_v5  ;;  %v4064_v8 = vld [vmem:[#allocation3 + $0x44] ss:$16 sps:$4 sm:$0xff]   ;;  %v4066_v9 = vld [vmem:[#allocation3 + $0x4c] ss:$16 sps:$4 sm:$0xff]   ;;  %v4068_v10 = vld [vmem:[#allocation3 + $0x40] ss:$16 sps:$4 sm:$0xff]  }
  0x7d   : > { %v4069_v11 = vld [vmem:[#allocation3 + $0x48] ss:$16 sps:$4 sm:$0xff]   ;;  %v4070_v12 = vld [vmem:[#allocation3 + $0x64] ss:$16 sps:$4 sm:$0xff]   ;;  %v4072_v13 = vld [vmem:[#allocation3 + $0x6c] ss:$16 sps:$4 sm:$0xff]  }
  0x7e   : > { %v4074_v14 = vld [vmem:[#allocation3 + $0x60] ss:$16 sps:$4 sm:$0xff]   ;;  %v4075_v15 = vld [vmem:[#allocation3 + $0x68] ss:$16 sps:$4 sm:$0xff]   ;;  %v4076_v16 = vld [vmem:[#allocation3 + $0x84] ss:$16 sps:$4 sm:$0xff]  }
  0x7f   : > { %1685 = vmatpush1.bf16.msra.mxu0 %v4062_v6  ;;  %1857 = vmatpush1.bf16.msra.mxu1 %v4063_v7  ;;  %v4078_v17 = vld [vmem:[#allocation3 + $0x8c] ss:$16 sps:$4 sm:$0xff]   ;;  %v4080_v18 = vld [vmem:[#allocation3 + $0x80] ss:$16 sps:$4 sm:$0xff]   ;;  %v4081_v19 = vld [vmem:[#allocation3 + $0x88] ss:$16 sps:$4 sm:$0xff]  }
  0x80   : > { %1686 = vmatprep.subr.bf16.mxu0 %v4064_v8  ;;  %1858 = vmatprep.subr.bf16.mxu1 %v4066_v9  ;;  %v4082_v20 = vld [vmem:[#allocation3 + $0xa4] ss:$16 sps:$4 sm:$0xff]   ;;  %v4084_v21 = vld [vmem:[#allocation3 + $0xac] ss:$16 sps:$4 sm:$0xff]   ;;  %v4086_v22 = vld [vmem:[#allocation3 + $0xa0] ss:$16 sps:$4 sm:$0xff]  }
  0x81   : > { %v4087_v23 = vld [vmem:[#allocation3 + $0xa8] ss:$16 sps:$4 sm:$0xff]   ;;  %v4088_v24 = vld [vmem:[#allocation3 + $0xc4] ss:$16 sps:$4 sm:$0xff]   ;;  %v4090_v25 = vld [vmem:[#allocation3 + $0xcc] ss:$16 sps:$4 sm:$0xff]  }
  0x82   : > { %v4092_v26 = vld [vmem:[#allocation3 + $0xc0] ss:$16 sps:$4 sm:$0xff]   ;;  %v4093_v27 = vld [vmem:[#allocation3 + $0xc8] ss:$16 sps:$4 sm:$0xff]   ;;  %v4094_v28 = vld [vmem:[#allocation3 + $0xe4] ss:$16 sps:$4 sm:$0xff]  }
  0x83   : > { %1687 = vmatpush1.bf16.msra.mxu0 %v4068_v10  ;;  %1859 = vmatpush1.bf16.msra.mxu1 %v4069_v11  ;;  %v4096_v29 = vld [vmem:[#allocation3 + $0xec] ss:$16 sps:$4 sm:$0xff]   ;;  %v4098_v30 = vld [vmem:[#allocation3 + $0xe0] ss:$16 sps:$4 sm:$0xff]   ;;  %v4099_v31 = vld [vmem:[#allocation3 + $0xe8] ss:$16 sps:$4 sm:$0xff]  }
  0x84   : > { %1688 = vmatprep.subr.bf16.mxu0 %v4070_v12  ;;  %1860 = vmatprep.subr.bf16.mxu1 %v4072_v13  ;;  %v4100_v32 = vld [vmem:[#allocation3 + $0x104] ss:$16 sps:$4 sm:$0xff]   ;;  %v4102_v33 = vld [vmem:[#allocation3 + $0x10c] ss:$16 sps:$4 sm:$0xff]   ;;  %v4104_v34 = vld [vmem:[#allocation3 + $0x100] ss:$16 sps:$4 sm:$0xff]  }
  0x85   : > { %v4105_v35 = vld [vmem:[#allocation3 + $0x108] ss:$16 sps:$4 sm:$0xff]   ;;  %v4106_v36 = vld [vmem:[#allocation3 + $0x124] ss:$16 sps:$4 sm:$0xff]   ;;  %v4108_v37 = vld [vmem:[#allocation3 + $0x12c] ss:$16 sps:$4 sm:$0xff]  }
  0x86   : > { %v4110_v38 = vld [vmem:[#allocation3 + $0x120] ss:$16 sps:$4 sm:$0xff]   ;;  %v4111_v39 = vld [vmem:[#allocation3 + $0x128] ss:$16 sps:$4 sm:$0xff]   ;;  %v4112_v40 = vld [vmem:[#allocation3 + $0x144] ss:$16 sps:$4 sm:$0xff]  }
  0x87   : > { %1689 = vmatpush1.bf16.msra.mxu0 %v4074_v14  ;;  %1861 = vmatpush1.bf16.msra.mxu1 %v4075_v15  ;;  %v4114_v41 = vld [vmem:[#allocation3 + $0x14c] ss:$16 sps:$4 sm:$0xff]   ;;  %v4116_v42 = vld [vmem:[#allocation3 + $0x140] ss:$16 sps:$4 sm:$0xff]   ;;  %v4117_v43 = vld [vmem:[#allocation3 + $0x148] ss:$16 sps:$4 sm:$0xff]  }
  0x88   : > { %1690 = vmatprep.subr.bf16.mxu0 %v4076_v16  ;;  %1862 = vmatprep.subr.bf16.mxu1 %v4078_v17  ;;  %v4118_v44 = vld [vmem:[#allocation3 + $0x164] ss:$16 sps:$4 sm:$0xff]   ;;  %v4120_v45 = vld [vmem:[#allocation3 + $0x16c] ss:$16 sps:$4 sm:$0xff]   ;;  %v4122_v47 = vld [vmem:[#allocation3 + $0x160] ss:$16 sps:$4 sm:$0xff]  }
  0x89   : > { %v310_v46 = vld [vmem:[#allocation2 + $0x8] sm:$0xff]  ;;  %v4123_v48 = vld [vmem:[#allocation3 + $0x168] ss:$16 sps:$4 sm:$0xff]   ;;  %v4126_v50 = vld [vmem:[#allocation3 + $0x18c] ss:$16 sps:$4 sm:$0xff]  }
  0x8a   : > { %1714 = vmatprep.mubr.bf16.mxu0 %v310_v46  ;;  %1886 = vmatprep.mubr.bf16.mxu1 %v310_v46  ;;  %v4124_v49 = vld [vmem:[#allocation3 + $0x184] ss:$16 sps:$4 sm:$0xff]   ;;  %v4128_v51 = vld [vmem:[#allocation3 + $0x180] ss:$16 sps:$4 sm:$0xff]   ;;  %v4129_v52 = vld [vmem:[#allocation3 + $0x188] ss:$16 sps:$4 sm:$0xff]  }
  0x8b   : > { %1691 = vmatpush1.bf16.msra.mxu0 %v4080_v18  ;;  %1863 = vmatpush1.bf16.msra.mxu1 %v4081_v19  ;;  %v4130_v53 = vld [vmem:[#allocation3 + $0x1a4] ss:$16 sps:$4 sm:$0xff]   ;;  %v4132_v54 = vld [vmem:[#allocation3 + $0x1ac] ss:$16 sps:$4 sm:$0xff]   ;;  %v4134_v55 = vld [vmem:[#allocation3 + $0x1a0] ss:$16 sps:$4 sm:$0xff]  }
  0x8c   : > { %1692 = vmatprep.subr.bf16.mxu0 %v4082_v20  ;;  %1864 = vmatprep.subr.bf16.mxu1 %v4084_v21  ;;  %v4135_v56 = vld [vmem:[#allocation3 + $0x1a8] ss:$16 sps:$4 sm:$0xff]   ;;  %v4136_v57 = vld [vmem:[#allocation3 + $0x1c4] ss:$16 sps:$4 sm:$0xff]   ;;  %v4138_v58 = vld [vmem:[#allocation3 + $0x1cc] ss:$16 sps:$4 sm:$0xff]  }
  0x8d   : > { %v4140_v59 = vld [vmem:[#allocation3 + $0x1c0] ss:$16 sps:$4 sm:$0xff]   ;;  %v4141_v60 = vld [vmem:[#allocation3 + $0x1c8] ss:$16 sps:$4 sm:$0xff]   ;;  %v4142_v61 = vld [vmem:[#allocation3 + $0x1e4] ss:$16 sps:$4 sm:$0xff]  }
  0x8e   : > { %v4144_v62 = vld [vmem:[#allocation3 + $0x1ec] ss:$16 sps:$4 sm:$0xff]   ;;  %v4146_v63 = vld [vmem:[#allocation3 + $0x1e0] ss:$16 sps:$4 sm:$0xff]   ;;  %v4147_v0 = vld [vmem:[#allocation3 + $0x1e8] ss:$16 sps:$4 sm:$0xff]  }
  0x8f   : > { %1693 = vmatpush1.bf16.msra.mxu0 %v4086_v22  ;;  %1865 = vmatpush1.bf16.msra.mxu1 %v4087_v23  ;;  %v4150_v1 = vld [vmem:[#allocation3 + $0x204] ss:$16 sps:$4 sm:$0xff]   ;;  %v4153_v2 = vld [vmem:[#allocation3 + $0x20c] ss:$16 sps:$4 sm:$0xff]   ;;  %v4148_v3 = vld [vmem:[#allocation3 + $0x200] ss:$16 sps:$4 sm:$0xff]  }
  0x90   : > { %1694 = vmatprep.subr.bf16.mxu0 %v4088_v24  ;;  %1866 = vmatprep.subr.bf16.mxu1 %v4090_v25  ;;  %v4151_v4 = vld [vmem:[#allocation3 + $0x208] ss:$16 sps:$4 sm:$0xff]   ;;  %v4156_v6 = vld [vmem:[#allocation3 + $0x224] ss:$16 sps:$4 sm:$0xff]   ;;  %v4159_v7 = vld [vmem:[#allocation3 + $0x22c] ss:$16 sps:$4 sm:$0xff]  }
  0x91   : > { %v309_v5 = vld [vmem:[#allocation2] sm:$0xff]  ;;  %v4154_v8 = vld [vmem:[#allocation3 + $0x220] ss:$16 sps:$4 sm:$0xff]   ;;  %v4162_v10 = vld [vmem:[#allocation3 + $0x244] ss:$16 sps:$4 sm:$0xff]  }
  0x92   : > { %v4157_v9 = vld [vmem:[#allocation3 + $0x228] ss:$16 sps:$4 sm:$0xff]   ;;  %v4165_v11 = vld [vmem:[#allocation3 + $0x24c] ss:$16 sps:$4 sm:$0xff]   ;;  %v4160_v12 = vld [vmem:[#allocation3 + $0x240] ss:$16 sps:$4 sm:$0xff]  }
  0x93   : > { %1695 = vmatpush1.bf16.msra.mxu0 %v4092_v26  ;;  %1867 = vmatpush1.bf16.msra.mxu1 %v4093_v27  ;;  %v4163_v13 = vld [vmem:[#allocation3 + $0x248] ss:$16 sps:$4 sm:$0xff]   ;;  %v4168_v14 = vld [vmem:[#allocation3 + $0x264] ss:$16 sps:$4 sm:$0xff]   ;;  %v4171_v15 = vld [vmem:[#allocation3 + $0x26c] ss:$16 sps:$4 sm:$0xff]  }
  0x94   : > { %1696 = vmatprep.subr.bf16.mxu0 %v4094_v28  ;;  %1868 = vmatprep.subr.bf16.mxu1 %v4096_v29  ;;  %v4166_v16 = vld [vmem:[#allocation3 + $0x260] ss:$16 sps:$4 sm:$0xff]   ;;  %v4169_v17 = vld [vmem:[#allocation3 + $0x268] ss:$16 sps:$4 sm:$0xff]   ;;  %v4174_v18 = vld [vmem:[#allocation3 + $0x284] ss:$16 sps:$4 sm:$0xff]  }
  0x95   : > { %v4177_v19 = vld [vmem:[#allocation3 + $0x28c] ss:$16 sps:$4 sm:$0xff]   ;;  %v4172_v20 = vld [vmem:[#allocation3 + $0x280] ss:$16 sps:$4 sm:$0xff]   ;;  %v4175_v21 = vld [vmem:[#allocation3 + $0x288] ss:$16 sps:$4 sm:$0xff]  }
  0x96   : > { %v4180_v22 = vld [vmem:[#allocation3 + $0x2a4] ss:$16 sps:$4 sm:$0xff]   ;;  %v4183_v23 = vld [vmem:[#allocation3 + $0x2ac] ss:$16 sps:$4 sm:$0xff]   ;;  %v4178_v24 = vld [vmem:[#allocation3 + $0x2a0] ss:$16 sps:$4 sm:$0xff]  }
  0x97   : > { %1697 = vmatpush1.bf16.msra.mxu0 %v4098_v30  ;;  %1869 = vmatpush1.bf16.msra.mxu1 %v4099_v31  ;;  %v4181_v25 = vld [vmem:[#allocation3 + $0x2a8] ss:$16 sps:$4 sm:$0xff]   ;;  %v4186_v26 = vld [vmem:[#allocation3 + $0x2c4] ss:$16 sps:$4 sm:$0xff]   ;;  %v4189_v27 = vld [vmem:[#allocation3 + $0x2cc] ss:$16 sps:$4 sm:$0xff]  }
  0x98   : > { %1698 = vmatprep.subr.bf16.mxu0 %v4100_v32  ;;  %1870 = vmatprep.subr.bf16.mxu1 %v4102_v33  ;;  %v312_v28 = vld [vmem:[#allocation2 + $0x18] sm:$0xff]  ;;  %v4187_v30 = vld [vmem:[#allocation3 + $0x2c8] ss:$16 sps:$4 sm:$0xff]   ;;  %v4195_v32 = vld [vmem:[#allocation3 + $0x2ec] ss:$16 sps:$4 sm:$0xff]  }
  0x99   : > { %v4184_v29 = vld [vmem:[#allocation3 + $0x2c0] ss:$16 sps:$4 sm:$0xff]   ;;  %v4192_v31 = vld [vmem:[#allocation3 + $0x2e4] ss:$16 sps:$4 sm:$0xff]   ;;  %v4211_v46 = vld [vmem:[#allocation3 + $0x348] ss:$16 sps:$4 sm:$0xff]  }
  0x9a   : > { %v4190_v33 = vld [vmem:[#allocation3 + $0x2e0] ss:$16 sps:$4 sm:$0xff]  }
  0x9b   : > { %1699 = vmatpush1.bf16.msra.mxu0 %v4104_v34  ;;  %1871 = vmatpush1.bf16.msra.mxu1 %v4105_v35  ;;  %v4193_v34 = vld [vmem:[#allocation3 + $0x2e8] ss:$16 sps:$4 sm:$0xff]   ;;  %v4198_v35 = vld [vmem:[#allocation3 + $0x304] ss:$16 sps:$4 sm:$0xff]  }
  0x9c   : > { %1700 = vmatprep.subr.bf16.mxu0 %v4106_v36  ;;  %1872 = vmatprep.subr.bf16.mxu1 %v4108_v37  ;;  %v4201_v36 = vld [vmem:[#allocation3 + $0x30c] ss:$16 sps:$4 sm:$0xff]   ;;  %v4196_v37 = vld [vmem:[#allocation3 + $0x300] ss:$16 sps:$4 sm:$0xff]  }
  0x9f   : > { %1701 = vmatpush1.bf16.msra.mxu0 %v4110_v38  ;;  %1873 = vmatpush1.bf16.msra.mxu1 %v4111_v39  ;;  %v4199_v38 = vld [vmem:[#allocation3 + $0x308] ss:$16 sps:$4 sm:$0xff]   ;;  %v4204_v39 = vld [vmem:[#allocation3 + $0x324] ss:$16 sps:$4 sm:$0xff]  }
  0xa0   : > { %1702 = vmatprep.subr.bf16.mxu0 %v4112_v40  ;;  %1874 = vmatprep.subr.bf16.mxu1 %v4114_v41  ;;  %v4207_v40 = vld [vmem:[#allocation3 + $0x32c] ss:$16 sps:$4 sm:$0xff]   ;;  %v4202_v41 = vld [vmem:[#allocation3 + $0x320] ss:$16 sps:$4 sm:$0xff]  }
  0xa3   : > { %1703 = vmatpush1.bf16.msra.mxu0 %v4116_v42  ;;  %1875 = vmatpush1.bf16.msra.mxu1 %v4117_v43  ;;  %v4205_v42 = vld [vmem:[#allocation3 + $0x328] ss:$16 sps:$4 sm:$0xff]   ;;  %v4210_v43 = vld [vmem:[#allocation3 + $0x344] ss:$16 sps:$4 sm:$0xff]  }
  0xa4   : > { %1704 = vmatprep.subr.bf16.mxu0 %v4118_v44  ;;  %1876 = vmatprep.subr.bf16.mxu1 %v4120_v45  ;;  %v4213_v44 = vld [vmem:[#allocation3 + $0x34c] ss:$16 sps:$4 sm:$0xff]   ;;  %v4208_v45 = vld [vmem:[#allocation3 + $0x340] ss:$16 sps:$4 sm:$0xff]  }
  0xa7   : > { %1705 = vmatpush1.bf16.msra.mxu0 %v4122_v47  ;;  %1877 = vmatpush1.bf16.msra.mxu1 %v4123_v48  ;;  %v4216_v47 = vld [vmem:[#allocation3 + $0x364] ss:$16 sps:$4 sm:$0xff]   ;;  %v4219_v48 = vld [vmem:[#allocation3 + $0x36c] ss:$16 sps:$4 sm:$0xff]  }
  0xa8   : > { %1706 = vmatprep.subr.bf16.mxu0 %v4124_v49  ;;  %1878 = vmatprep.subr.bf16.mxu1 %v4126_v50  ;;  %v4214_v49 = vld [vmem:[#allocation3 + $0x360] ss:$16 sps:$4 sm:$0xff]   ;;  %v4217_v50 = vld [vmem:[#allocation3 + $0x368] ss:$16 sps:$4 sm:$0xff]  }
  0xab   : > { %1707 = vmatpush1.bf16.msra.mxu0 %v4128_v51  ;;  %1879 = vmatpush1.bf16.msra.mxu1 %v4129_v52  ;;  %v4222_v51 = vld [vmem:[#allocation3 + $0x384] ss:$16 sps:$4 sm:$0xff]   ;;  %v4225_v52 = vld [vmem:[#allocation3 + $0x38c] ss:$16 sps:$4 sm:$0xff]  }
  0xac   : > { %1708 = vmatprep.subr.bf16.mxu0 %v4130_v53  ;;  %1880 = vmatprep.subr.bf16.mxu1 %v4132_v54  ;;  %v4220_v53 = vld [vmem:[#allocation3 + $0x380] ss:$16 sps:$4 sm:$0xff]   ;;  %v4223_v54 = vld [vmem:[#allocation3 + $0x388] ss:$16 sps:$4 sm:$0xff]  }
  0xaf   : > { %1709 = vmatpush1.bf16.msra.mxu0 %v4134_v55  ;;  %1881 = vmatpush1.bf16.msra.mxu1 %v4135_v56  ;;  %v4228_v55 = vld [vmem:[#allocation3 + $0x3a4] ss:$16 sps:$4 sm:$0xff]   ;;  %v4231_v56 = vld [vmem:[#allocation3 + $0x3ac] ss:$16 sps:$4 sm:$0xff]  }
  0xb0   : > { %1710 = vmatprep.subr.bf16.mxu0 %v4136_v57  ;;  %1882 = vmatprep.subr.bf16.mxu1 %v4138_v58  ;;  %v4226_v57 = vld [vmem:[#allocation3 + $0x3a0] ss:$16 sps:$4 sm:$0xff]   ;;  %v4229_v58 = vld [vmem:[#allocation3 + $0x3a8] ss:$16 sps:$4 sm:$0xff]  }
  0xb3   : > { %1711 = vmatpush1.bf16.msra.mxu0 %v4140_v59  ;;  %1883 = vmatpush1.bf16.msra.mxu1 %v4141_v60  ;;  %v4234_v59 = vld [vmem:[#allocation3 + $0x3c4] ss:$16 sps:$4 sm:$0xff]   ;;  %v4237_v60 = vld [vmem:[#allocation3 + $0x3cc] ss:$16 sps:$4 sm:$0xff]  }
  0xb4   : > { %1712 = vmatprep.subr.bf16.mxu0 %v4142_v61  ;;  %1884 = vmatprep.subr.bf16.mxu1 %v4144_v62  ;;  %v4232_v61 = vld [vmem:[#allocation3 + $0x3c0] ss:$16 sps:$4 sm:$0xff]   ;;  %v4235_v62 = vld [vmem:[#allocation3 + $0x3c8] ss:$16 sps:$4 sm:$0xff]  }
  0xb7   : > { %1713 = vmatpush1.bf16.msra.mxu0 %v4146_v63  ;;  %1885 = vmatpush1.bf16.msra.mxu1 %v4147_v0  ;;  %v4240_v63 = vld [vmem:[#allocation3 + $0x3e4] ss:$16 sps:$4 sm:$0xff]   ;;  %v4243_v0 = vld [vmem:[#allocation3 + $0x3ec] ss:$16 sps:$4 sm:$0xff]  }
  0xb8   : > { %1725 = vmatprep.subr.bf16.mxu0 %v4150_v1  ;;  %1897 = vmatprep.subr.bf16.mxu1 %v4153_v2  ;;  %v4238_v1 = vld [vmem:[#allocation3 + $0x3e0] ss:$16 sps:$4 sm:$0xff]   ;;  %v4241_v2 = vld [vmem:[#allocation3 + $0x3e8] ss:$16 sps:$4 sm:$0xff]  }
  0xba   : > { %1715 = vmatmul.mubr.bf16.vlgmr.msra.gmra.mrb[0].mxu0 %v309_v5  ;;  %1887 = vmatmul.mubr.bf16.vlgmr.msra.gmra.mrb[0].mxu1 %v309_v5  ;;  %v4244_v5 = vld [vmem:[#allocation3 + $0x400] ss:$16 sps:$4 sm:$0xff]  }
  0xbb   : > { %1726 = vmatpush1.bf16.msra.mxu0 %v4148_v3  ;;  %1898 = vmatpush1.bf16.msra.mxu1 %v4151_v4  ;;  %v4246_v3 = vld [vmem:[#allocation3 + $0x404] ss:$16 sps:$4 sm:$0xff]   ;;  %v4249_v4 = vld [vmem:[#allocation3 + $0x40c] ss:$16 sps:$4 sm:$0xff]  }
  0xbc   : > { %1727 = vmatprep.subr.bf16.mxu0 %v4156_v6  ;;  %1899 = vmatprep.subr.bf16.mxu1 %v4159_v7  ;;  %v4247_v6 = vld [vmem:[#allocation3 + $0x408] ss:$16 sps:$4 sm:$0xff]  }
  0xbd   : > { %1757 = vmatprep.mubr.bf16.mxu0 %v312_v28  ;;  %1929 = vmatprep.mubr.bf16.mxu1 %v312_v28  ;;  %v311_v7 = vld [vmem:[#allocation2 + $0x10] sm:$0xff] }
  0xbe   : > { %v4277_v28 = vld [vmem:[#allocation3 + $0x4a8] ss:$16 sps:$4 sm:$0xff]  }
  0xbf   : > { %1728 = vmatpush1.bf16.msra.mxu0 %v4154_v8  ;;  %1900 = vmatpush1.bf16.msra.mxu1 %v4157_v9  ;;  %v4252_v8 = vld [vmem:[#allocation3 + $0x424] ss:$16 sps:$4 sm:$0xff]   ;;  %v4255_v9 = vld [vmem:[#allocation3 + $0x42c] ss:$16 sps:$4 sm:$0xff]  }
  0xc0   : > { %1729 = vmatprep.subr.bf16.mxu0 %v4162_v10  ;;  %1901 = vmatprep.subr.bf16.mxu1 %v4165_v11  ;;  %v314_v10 = vld [vmem:[#allocation2 + $0x28] sm:$0xff] }
  0xc1   : > { %v4250_v11 = vld [vmem:[#allocation3 + $0x420] ss:$16 sps:$4 sm:$0xff]  }
  0xc3   : > { %1730 = vmatpush1.bf16.msra.mxu0 %v4160_v12  ;;  %1902 = vmatpush1.bf16.msra.mxu1 %v4163_v13  ;;  %v4253_v12 = vld [vmem:[#allocation3 + $0x428] ss:$16 sps:$4 sm:$0xff]   ;;  %v4258_v13 = vld [vmem:[#allocation3 + $0x444] ss:$16 sps:$4 sm:$0xff]  }
  0xc4   : > { %1731 = vmatprep.subr.bf16.mxu0 %v4168_v14  ;;  %1903 = vmatprep.subr.bf16.mxu1 %v4171_v15  ;;  %v4261_v14 = vld [vmem:[#allocation3 + $0x44c] ss:$16 sps:$4 sm:$0xff]   ;;  %v4256_v15 = vld [vmem:[#allocation3 + $0x440] ss:$16 sps:$4 sm:$0xff]  }
  0xc7   : > { %1732 = vmatpush1.bf16.msra.mxu0 %v4166_v16  ;;  %1904 = vmatpush1.bf16.msra.mxu1 %v4169_v17  ;;  %v4259_v16 = vld [vmem:[#allocation3 + $0x448] ss:$16 sps:$4 sm:$0xff]   ;;  %v4264_v17 = vld [vmem:[#allocation3 + $0x464] ss:$16 sps:$4 sm:$0xff]  }
  0xc8   : > { %1733 = vmatprep.subr.bf16.mxu0 %v4174_v18  ;;  %1905 = vmatprep.subr.bf16.mxu1 %v4177_v19  ;;  %v4267_v18 = vld [vmem:[#allocation3 + $0x46c] ss:$16 sps:$4 sm:$0xff]   ;;  %v4262_v19 = vld [vmem:[#allocation3 + $0x460] ss:$16 sps:$4 sm:$0xff]  }
  0xcb   : > { %1734 = vmatpush1.bf16.msra.mxu0 %v4172_v20  ;;  %1906 = vmatpush1.bf16.msra.mxu1 %v4175_v21  ;;  %v4265_v20 = vld [vmem:[#allocation3 + $0x468] ss:$16 sps:$4 sm:$0xff]   ;;  %v4270_v21 = vld [vmem:[#allocation3 + $0x484] ss:$16 sps:$4 sm:$0xff]  }
  0xcc   : > { %1735 = vmatprep.subr.bf16.mxu0 %v4180_v22  ;;  %1907 = vmatprep.subr.bf16.mxu1 %v4183_v23  ;;  %v4273_v22 = vld [vmem:[#allocation3 + $0x48c] ss:$16 sps:$4 sm:$0xff]   ;;  %v4268_v23 = vld [vmem:[#allocation3 + $0x480] ss:$16 sps:$4 sm:$0xff]  }
  0xcf   : > { %1736 = vmatpush1.bf16.msra.mxu0 %v4178_v24  ;;  %1908 = vmatpush1.bf16.msra.mxu1 %v4181_v25  ;;  %v4271_v24 = vld [vmem:[#allocation3 + $0x488] ss:$16 sps:$4 sm:$0xff]   ;;  %v4276_v25 = vld [vmem:[#allocation3 + $0x4a4] ss:$16 sps:$4 sm:$0xff]  }
  0xd0   : > { %1737 = vmatprep.subr.bf16.mxu0 %v4186_v26  ;;  %1909 = vmatprep.subr.bf16.mxu1 %v4189_v27  ;;  %v4279_v26 = vld [vmem:[#allocation3 + $0x4ac] ss:$16 sps:$4 sm:$0xff]   ;;  %v4274_v27 = vld [vmem:[#allocation3 + $0x4a0] ss:$16 sps:$4 sm:$0xff]  }
  0xd3   : > { %1738 = vmatpush1.bf16.msra.mxu0 %v4184_v29  ;;  %1910 = vmatpush1.bf16.msra.mxu1 %v4187_v30  ;;  %v4282_v29 = vld [vmem:[#allocation3 + $0x4c4] ss:$16 sps:$4 sm:$0xff]   ;;  %v4285_v30 = vld [vmem:[#allocation3 + $0x4cc] ss:$16 sps:$4 sm:$0xff]  }
  0xd4   : > { %1739 = vmatprep.subr.bf16.mxu0 %v4192_v31  ;;  %1911 = vmatprep.subr.bf16.mxu1 %v4195_v32  ;;  %v4280_v31 = vld [vmem:[#allocation3 + $0x4c0] ss:$16 sps:$4 sm:$0xff]   ;;  %v4283_v32 = vld [vmem:[#allocation3 + $0x4c8] ss:$16 sps:$4 sm:$0xff]  }
  0xd7   : > { %1740 = vmatpush1.bf16.msra.mxu0 %v4190_v33  ;;  %1912 = vmatpush1.bf16.msra.mxu1 %v4193_v34  ;;  %v4288_v33 = vld [vmem:[#allocation3 + $0x4e4] ss:$16 sps:$4 sm:$0xff]   ;;  %v4291_v34 = vld [vmem:[#allocation3 + $0x4ec] ss:$16 sps:$4 sm:$0xff]  }
  0xd8   : > { %1741 = vmatprep.subr.bf16.mxu0 %v4198_v35  ;;  %1913 = vmatprep.subr.bf16.mxu1 %v4201_v36  ;;  %v4286_v35 = vld [vmem:[#allocation3 + $0x4e0] ss:$16 sps:$4 sm:$0xff]   ;;  %v4289_v36 = vld [vmem:[#allocation3 + $0x4e8] ss:$16 sps:$4 sm:$0xff]  }
  0xdb   : > { %1742 = vmatpush1.bf16.msra.mxu0 %v4196_v37  ;;  %1914 = vmatpush1.bf16.msra.mxu1 %v4199_v38  ;;  %v4294_v37 = vld [vmem:[#allocation3 + $0x504] ss:$16 sps:$4 sm:$0xff]   ;;  %v4297_v38 = vld [vmem:[#allocation3 + $0x50c] ss:$16 sps:$4 sm:$0xff]  }
  0xdc   : > { %1743 = vmatprep.subr.bf16.mxu0 %v4204_v39  ;;  %1915 = vmatprep.subr.bf16.mxu1 %v4207_v40  ;;  %v4292_v39 = vld [vmem:[#allocation3 + $0x500] ss:$16 sps:$4 sm:$0xff]   ;;  %v4295_v40 = vld [vmem:[#allocation3 + $0x508] ss:$16 sps:$4 sm:$0xff]  }
  0xdf   : > { %1744 = vmatpush1.bf16.msra.mxu0 %v4202_v41  ;;  %1916 = vmatpush1.bf16.msra.mxu1 %v4205_v42  ;;  %v4300_v41 = vld [vmem:[#allocation3 + $0x524] ss:$16 sps:$4 sm:$0xff]   ;;  %v4303_v42 = vld [vmem:[#allocation3 + $0x52c] ss:$16 sps:$4 sm:$0xff]  }
  0xe0   : > { %1745 = vmatprep.subr.bf16.mxu0 %v4210_v43  ;;  %1917 = vmatprep.subr.bf16.mxu1 %v4213_v44  ;;  %v4298_v43 = vld [vmem:[#allocation3 + $0x520] ss:$16 sps:$4 sm:$0xff]   ;;  %v4301_v44 = vld [vmem:[#allocation3 + $0x528] ss:$16 sps:$4 sm:$0xff]  }
  0xe3   : > { %1746 = vmatpush1.bf16.msra.mxu0 %v4208_v45  ;;  %1918 = vmatpush1.bf16.msra.mxu1 %v4211_v46  ;;  %v4306_v45 = vld [vmem:[#allocation3 + $0x544] ss:$16 sps:$4 sm:$0xff]   ;;  %v4309_v46 = vld [vmem:[#allocation3 + $0x54c] ss:$16 sps:$4 sm:$0xff]  }
  0xe4   : > { %1747 = vmatprep.subr.bf16.mxu0 %v4216_v47  ;;  %1919 = vmatprep.subr.bf16.mxu1 %v4219_v48  ;;  %v4304_v47 = vld [vmem:[#allocation3 + $0x540] ss:$16 sps:$4 sm:$0xff]   ;;  %v4307_v48 = vld [vmem:[#allocation3 + $0x548] ss:$16 sps:$4 sm:$0xff]  }
  0xe7   : > { %1748 = vmatpush1.bf16.msra.mxu0 %v4214_v49  ;;  %1920 = vmatpush1.bf16.msra.mxu1 %v4217_v50  ;;  %v4312_v49 = vld [vmem:[#allocation3 + $0x564] ss:$16 sps:$4 sm:$0xff]   ;;  %v4315_v50 = vld [vmem:[#allocation3 + $0x56c] ss:$16 sps:$4 sm:$0xff]  }
  0xe8   : > { %1749 = vmatprep.subr.bf16.mxu0 %v4222_v51  ;;  %1921 = vmatprep.subr.bf16.mxu1 %v4225_v52  ;;  %v4310_v51 = vld [vmem:[#allocation3 + $0x560] ss:$16 sps:$4 sm:$0xff]   ;;  %v4313_v52 = vld [vmem:[#allocation3 + $0x568] ss:$16 sps:$4 sm:$0xff]  }
  0xeb   : > { %1750 = vmatpush1.bf16.msra.mxu0 %v4220_v53  ;;  %1922 = vmatpush1.bf16.msra.mxu1 %v4223_v54  ;;  %v4318_v53 = vld [vmem:[#allocation3 + $0x584] ss:$16 sps:$4 sm:$0xff]   ;;  %v4321_v54 = vld [vmem:[#allocation3 + $0x58c] ss:$16 sps:$4 sm:$0xff]  }
  0xec   : > { %1751 = vmatprep.subr.bf16.mxu0 %v4228_v55  ;;  %1923 = vmatprep.subr.bf16.mxu1 %v4231_v56  ;;  %v4316_v55 = vld [vmem:[#allocation3 + $0x580] ss:$16 sps:$4 sm:$0xff]   ;;  %v4319_v56 = vld [vmem:[#allocation3 + $0x588] ss:$16 sps:$4 sm:$0xff]  }
  0xef   : > { %1752 = vmatpush1.bf16.msra.mxu0 %v4226_v57  ;;  %1924 = vmatpush1.bf16.msra.mxu1 %v4229_v58  ;;  %v4324_v57 = vld [vmem:[#allocation3 + $0x5a4] ss:$16 sps:$4 sm:$0xff]   ;;  %v4327_v58 = vld [vmem:[#allocation3 + $0x5ac] ss:$16 sps:$4 sm:$0xff]  }
  0xf0   : > { %1753 = vmatprep.subr.bf16.mxu0 %v4234_v59  ;;  %1925 = vmatprep.subr.bf16.mxu1 %v4237_v60  ;;  %v4322_v59 = vld [vmem:[#allocation3 + $0x5a0] ss:$16 sps:$4 sm:$0xff]   ;;  %v4325_v60 = vld [vmem:[#allocation3 + $0x5a8] ss:$16 sps:$4 sm:$0xff]  }
  0xf3   : > { %1754 = vmatpush1.bf16.msra.mxu0 %v4232_v61  ;;  %1926 = vmatpush1.bf16.msra.mxu1 %v4235_v62  ;;  %v4330_v61 = vld [vmem:[#allocation3 + $0x5c4] ss:$16 sps:$4 sm:$0xff]   ;;  %v4333_v62 = vld [vmem:[#allocation3 + $0x5cc] ss:$16 sps:$4 sm:$0xff]  }
  0xf4   : > { %1755 = vmatprep.subr.bf16.mxu0 %v4240_v63  ;;  %1927 = vmatprep.subr.bf16.mxu1 %v4243_v0  ;;  %v4328_v63 = vld [vmem:[#allocation3 + $0x5c0] ss:$16 sps:$4 sm:$0xff]   ;;  %v4331_v0 = vld [vmem:[#allocation3 + $0x5c8] ss:$16 sps:$4 sm:$0xff]  }
  0xf7   : > { %1756 = vmatpush1.bf16.msra.mxu0 %v4238_v1  ;;  %1928 = vmatpush1.bf16.msra.mxu1 %v4241_v2  ;;  %v4336_v1 = vld [vmem:[#allocation3 + $0x5e4] ss:$16 sps:$4 sm:$0xff]   ;;  %v4339_v2 = vld [vmem:[#allocation3 + $0x5ec] ss:$16 sps:$4 sm:$0xff]  }
  0xf8   : > { %1768 = vmatprep.subr.bf16.mxu0 %v4246_v3  ;;  %1940 = vmatprep.subr.bf16.mxu1 %v4249_v4  ;;  %v4334_v3 = vld [vmem:[#allocation3 + $0x5e0] ss:$16 sps:$4 sm:$0xff]   ;;  %v4337_v4 = vld [vmem:[#allocation3 + $0x5e8] ss:$16 sps:$4 sm:$0xff]  }
  0xfa   : > { %1758 = vmatmul.mubr.bf16.vlgmr.msra.gmra.mrb[0].mxu0 %v311_v7  ;;  %1930 = vmatmul.mubr.bf16.vlgmr.msra.gmra.mrb[0].mxu1 %v311_v7  ;;  %v4340_v7 = vld [vmem:[#allocation3 + $0x600] ss:$16 sps:$4 sm:$0xff]  }
  0xfb   : > { %1769 = vmatpush1.bf16.msra.mxu0 %v4244_v5  ;;  %1941 = vmatpush1.bf16.msra.mxu1 %v4247_v6  ;;  %v4342_v5 = vld [vmem:[#allocation3 + $0x604] ss:$16 sps:$4 sm:$0xff]   ;;  %v4345_v6 = vld [vmem:[#allocation3 + $0x60c] ss:$16 sps:$4 sm:$0xff]  }
  0xfc   : > { %1770 = vmatprep.subr.bf16.mxu0 %v4252_v8  ;;  %1942 = vmatprep.subr.bf16.mxu1 %v4255_v9  ;;  %v4343_v8 = vld [vmem:[#allocation3 + $0x608] ss:$16 sps:$4 sm:$0xff]  }
  0xfd   : > { %1800 = vmatprep.mubr.bf16.mxu0 %v314_v10  ;;  %1972 = vmatprep.mubr.bf16.mxu1 %v314_v10  ;;  %v313_v9 = vld [vmem:[#allocation2 + $0x20] sm:$0xff]  ;;  %v4348_v10 = vld [vmem:[#allocation3 + $0x624] ss:$16 sps:$4 sm:$0xff]  }
  0xff   : > { %1771 = vmatpush1.bf16.msra.mxu0 %v4250_v11  ;;  %1943 = vmatpush1.bf16.msra.mxu1 %v4253_v12  ;;  %v4351_v11 = vld [vmem:[#allocation3 + $0x62c] ss:$16 sps:$4 sm:$0xff]   ;;  %v4346_v12 = vld [vmem:[#allocation3 + $0x620] ss:$16 sps:$4 sm:$0xff]  }
 0x100   : > { %1772 = vmatprep.subr.bf16.mxu0 %v4258_v13  ;;  %1944 = vmatprep.subr.bf16.mxu1 %v4261_v14  ;;  %v4349_v13 = vld [vmem:[#allocation3 + $0x628] ss:$16 sps:$4 sm:$0xff]   ;;  %v4354_v14 = vld [vmem:[#allocation3 + $0x644] ss:$16 sps:$4 sm:$0xff]  }
 0x103   : > { %1773 = vmatpush1.bf16.msra.mxu0 %v4256_v15  ;;  %1945 = vmatpush1.bf16.msra.mxu1 %v4259_v16  ;;  %v4357_v15 = vld [vmem:[#allocation3 + $0x64c] ss:$16 sps:$4 sm:$0xff]   ;;  %v4763_v16 = vmov 0  }
 0x104   : > { %1774 = vmatprep.subr.bf16.mxu0 %v4264_v17  ;;  %1946 = vmatprep.subr.bf16.mxu1 %v4267_v18  ;;  %v4352_v17 = vld [vmem:[#allocation3 + $0x640] ss:$16 sps:$4 sm:$0xff]   ;;  %v4355_v18 = vld [vmem:[#allocation3 + $0x648] ss:$16 sps:$4 sm:$0xff]  }
 0x107   : > { %1775 = vmatpush1.bf16.msra.mxu0 %v4262_v19  ;;  %1947 = vmatpush1.bf16.msra.mxu1 %v4265_v20  ;;  %v4360_v19 = vld [vmem:[#allocation3 + $0x664] ss:$16 sps:$4 sm:$0xff]   ;;  %v4363_v20 = vld [vmem:[#allocation3 + $0x66c] ss:$16 sps:$4 sm:$0xff]  }
 0x108   : > { %1776 = vmatprep.subr.bf16.mxu0 %v4270_v21  ;;  %1948 = vmatprep.subr.bf16.mxu1 %v4273_v22  ;;  %v4358_v21 = vld [vmem:[#allocation3 + $0x660] ss:$16 sps:$4 sm:$0xff]   ;;  %v4361_v22 = vld [vmem:[#allocation3 + $0x668] ss:$16 sps:$4 sm:$0xff]  }
 0x10b   : > { %1777 = vmatpush1.bf16.msra.mxu0 %v4268_v23  ;;  %1949 = vmatpush1.bf16.msra.mxu1 %v4271_v24  ;;  %v4366_v23 = vld [vmem:[#allocation3 + $0x684] ss:$16 sps:$4 sm:$0xff]   ;;  %v4369_v24 = vld [vmem:[#allocation3 + $0x68c] ss:$16 sps:$4 sm:$0xff]  }
 0x10c   : > { %1778 = vmatprep.subr.bf16.mxu0 %v4276_v25  ;;  %1950 = vmatprep.subr.bf16.mxu1 %v4279_v26  ;;  %v4364_v25 = vld [vmem:[#allocation3 + $0x680] ss:$16 sps:$4 sm:$0xff]   ;;  %v4367_v26 = vld [vmem:[#allocation3 + $0x688] ss:$16 sps:$4 sm:$0xff]  }
 0x10f   : > { %1779 = vmatpush1.bf16.msra.mxu0 %v4274_v27  ;;  %1951 = vmatpush1.bf16.msra.mxu1 %v4277_v28  ;;  %v4372_v27 = vld [vmem:[#allocation3 + $0x6a4] ss:$16 sps:$4 sm:$0xff]   ;;  %v4375_v28 = vld [vmem:[#allocation3 + $0x6ac] ss:$16 sps:$4 sm:$0xff]  }
 0x110   : > { %1780 = vmatprep.subr.bf16.mxu0 %v4282_v29  ;;  %1952 = vmatprep.subr.bf16.mxu1 %v4285_v30  ;;  %v4370_v29 = vld [vmem:[#allocation3 + $0x6a0] ss:$16 sps:$4 sm:$0xff]   ;;  %v4373_v30 = vld [vmem:[#allocation3 + $0x6a8] ss:$16 sps:$4 sm:$0xff]  }
 0x113   : > { %1781 = vmatpush1.bf16.msra.mxu0 %v4280_v31  ;;  %1953 = vmatpush1.bf16.msra.mxu1 %v4283_v32  ;;  %v4378_v31 = vld [vmem:[#allocation3 + $0x6c4] ss:$16 sps:$4 sm:$0xff]   ;;  %v4381_v32 = vld [vmem:[#allocation3 + $0x6cc] ss:$16 sps:$4 sm:$0xff]  }
 0x114   : > { %1782 = vmatprep.subr.bf16.mxu0 %v4288_v33  ;;  %1954 = vmatprep.subr.bf16.mxu1 %v4291_v34  ;;  %v4376_v33 = vld [vmem:[#allocation3 + $0x6c0] ss:$16 sps:$4 sm:$0xff]   ;;  %v4379_v34 = vld [vmem:[#allocation3 + $0x6c8] ss:$16 sps:$4 sm:$0xff]  }
 0x117   : > { %1783 = vmatpush1.bf16.msra.mxu0 %v4286_v35  ;;  %1955 = vmatpush1.bf16.msra.mxu1 %v4289_v36  ;;  %v4384_v35 = vld [vmem:[#allocation3 + $0x6e4] ss:$16 sps:$4 sm:$0xff]   ;;  %v4387_v36 = vld [vmem:[#allocation3 + $0x6ec] ss:$16 sps:$4 sm:$0xff]  }
 0x118   : > { %1784 = vmatprep.subr.bf16.mxu0 %v4294_v37  ;;  %1956 = vmatprep.subr.bf16.mxu1 %v4297_v38  ;;  %v4382_v37 = vld [vmem:[#allocation3 + $0x6e0] ss:$16 sps:$4 sm:$0xff]   ;;  %v4385_v38 = vld [vmem:[#allocation3 + $0x6e8] ss:$16 sps:$4 sm:$0xff]  }
 0x11b   : > { %1785 = vmatpush1.bf16.msra.mxu0 %v4292_v39  ;;  %1957 = vmatpush1.bf16.msra.mxu1 %v4295_v40  ;;  %v315_v39 = vld [vmem:[#allocation2 + $0x30] sm:$0xff]  ;;  %v542_v40 = vlaneseq }
 0x11c   : > { %1786 = vmatprep.subr.bf16.mxu0 %v4300_v41  ;;  %1958 = vmatprep.subr.bf16.mxu1 %v4303_v42 }
 0x11d   : > { %v543_v41 = vshrl.u32 %v542_v40, 7 }
 0x11f   : > { %1787 = vmatpush1.bf16.msra.mxu0 %v4298_v43  ;;  %1959 = vmatpush1.bf16.msra.mxu1 %v4301_v44  ;;  %v544_v42 = vsub.s32 0, %v543_v41  ;;  %v552_v43 = vsub.s32 2, %v543_v41  ;;  %v540_v44 = vld [vmem:[%s4932_s29] sm:$0xf] }
 0x120   : > { %1788 = vmatprep.subr.bf16.mxu0 %v4306_v45  ;;  %1960 = vmatprep.subr.bf16.mxu1 %v4309_v46  ;;  %v548_v45 = vsub.s32 1, %v543_v41  ;;  %v556_v46 = vsub.s32 3, %v543_v41 }
 0x123   : > { %1789 = vmatpush1.bf16.msra.mxu0 %v4304_v47  ;;  %1961 = vmatpush1.bf16.msra.mxu1 %v4307_v48  ;;  %v545_v47 = vrot.slane %v540_v44, %v544_v42  ;;  %v553_v48 = vrot.slane %v540_v44, %v552_v43 }
 0x124   : > { %1790 = vmatprep.subr.bf16.mxu0 %v4312_v49  ;;  %1962 = vmatprep.subr.bf16.mxu1 %v4315_v50  ;;  %v549_v49 = vrot.slane %v540_v44, %v548_v45  ;;  %v557_v50 = vrot.slane %v540_v44, %v556_v46 }
 0x127   : > { %1791 = vmatpush1.bf16.msra.mxu0 %v4310_v51  ;;  %1963 = vmatpush1.bf16.msra.mxu1 %v4313_v52 }
 0x128   : > { %1792 = vmatprep.subr.bf16.mxu0 %v4318_v53  ;;  %1964 = vmatprep.subr.bf16.mxu1 %v4321_v54 }
 0x12b   : > { %1793 = vmatpush1.bf16.msra.mxu0 %v4316_v55  ;;  %1965 = vmatpush1.bf16.msra.mxu1 %v4319_v56 }
 0x12c   : > { %1794 = vmatprep.subr.bf16.mxu0 %v4324_v57  ;;  %1966 = vmatprep.subr.bf16.mxu1 %v4327_v58 }
 0x12f   : > { %1795 = vmatpush1.bf16.msra.mxu0 %v4322_v59  ;;  %1967 = vmatpush1.bf16.msra.mxu1 %v4325_v60 }
 0x130   : > { %1796 = vmatprep.subr.bf16.mxu0 %v4330_v61  ;;  %1968 = vmatprep.subr.bf16.mxu1 %v4333_v62 }
 0x133   : > { %1797 = vmatpush1.bf16.msra.mxu0 %v4328_v63  ;;  %1969 = vmatpush1.bf16.msra.mxu1 %v4331_v0 }
 0x134   : > { %1798 = vmatprep.subr.bf16.mxu0 %v4336_v1  ;;  %1970 = vmatprep.subr.bf16.mxu1 %v4339_v2 }
 0x137   : > { %1799 = vmatpush1.bf16.msra.mxu0 %v4334_v3  ;;  %1971 = vmatpush1.bf16.msra.mxu1 %v4337_v4 }
 0x138   : > { %1811 = vmatprep.subr.bf16.mxu0 %v4342_v5  ;;  %1983 = vmatprep.subr.bf16.mxu1 %v4345_v6 }
 0x13a   : > { %1801 = vmatmul.mubr.bf16.vlgmr.msra.gmra.mrb[0].mxu0 %v313_v9  ;;  %1973 = vmatmul.mubr.bf16.vlgmr.msra.gmra.mrb[0].mxu1 %v313_v9 }
 0x13b   : > { %1812 = vmatpush1.bf16.msra.mxu0 %v4340_v7  ;;  %1984 = vmatpush1.bf16.msra.mxu1 %v4343_v8 }
 0x13c   : > { %1813 = vmatprep.subr.bf16.mxu0 %v4348_v10  ;;  %1985 = vmatprep.subr.bf16.mxu1 %v4351_v11 }
 0x13d   : > { %1843 = vmatprep.mubr.bf16.mxu0 %v4763_v16  ;;  %2015 = vmatprep.mubr.bf16.mxu1 %v4763_v16 }
 0x13f   : > { %1814 = vmatpush1.bf16.msra.mxu0 %v4346_v12  ;;  %1986 = vmatpush1.bf16.msra.mxu1 %v4349_v13 }
 0x140   : > { %1815 = vmatprep.subr.bf16.mxu0 %v4354_v14  ;;  %1987 = vmatprep.subr.bf16.mxu1 %v4357_v15 }
 0x143   : > { %1816 = vmatpush1.bf16.msra.mxu0 %v4352_v17  ;;  %1988 = vmatpush1.bf16.msra.mxu1 %v4355_v18 }
 0x144   : > { %1817 = vmatprep.subr.bf16.mxu0 %v4360_v19  ;;  %1989 = vmatprep.subr.bf16.mxu1 %v4363_v20 }
 0x147   : > { %1818 = vmatpush1.bf16.msra.mxu0 %v4358_v21  ;;  %1990 = vmatpush1.bf16.msra.mxu1 %v4361_v22 }
 0x148   : > { %1819 = vmatprep.subr.bf16.mxu0 %v4366_v23  ;;  %1991 = vmatprep.subr.bf16.mxu1 %v4369_v24 }
 0x14b   : > { %1820 = vmatpush1.bf16.msra.mxu0 %v4364_v25  ;;  %1992 = vmatpush1.bf16.msra.mxu1 %v4367_v26 }
 0x14c   : > { %1821 = vmatprep.subr.bf16.mxu0 %v4372_v27  ;;  %1993 = vmatprep.subr.bf16.mxu1 %v4375_v28 }
 0x14f   : > { %1822 = vmatpush1.bf16.msra.mxu0 %v4370_v29  ;;  %1994 = vmatpush1.bf16.msra.mxu1 %v4373_v30 }
 0x150   : > { %1823 = vmatprep.subr.bf16.mxu0 %v4378_v31  ;;  %1995 = vmatprep.subr.bf16.mxu1 %v4381_v32 }
 0x153   : > { %1824 = vmatpush1.bf16.msra.mxu0 %v4376_v33  ;;  %1996 = vmatpush1.bf16.msra.mxu1 %v4379_v34 }
 0x154   : > { %1825 = vmatprep.subr.bf16.mxu0 %v4384_v35  ;;  %1997 = vmatprep.subr.bf16.mxu1 %v4387_v36 }
 0x157   : > { %1826 = vmatpush1.bf16.msra.mxu0 %v4382_v37  ;;  %1998 = vmatpush1.bf16.msra.mxu1 %v4385_v38 }
 0x15a   : > { %1844 = vmatmul.mubr.bf16.vlgmr.msra.gmra.mrb[0].mxu0 %v315_v39  ;;  %2016 = vmatmul.mubr.bf16.vlgmr.msra.gmra.mrb[0].mxu1 %v315_v39 }
 0x22d   : > { %v1845_v51 = vpop.f32.mrb[0].mxu0  ;;  %v2017_v52 = vpop.f32.mrb[0].mxu1 }
 0x22e   : > { %v3945_v53 = vadd.f32 %v1845_v51, %v545_v47  ;;  %v3949_v54 = vadd.f32 %v2017_v52, %v553_v48  ;;  %v1847_v55 = vpop.f32.mrb[1].mxu0  ;;  %v2019_v56 = vpop.f32.mrb[1].mxu1 }
 0x22f   : > { %v3946_v57 = vadd.f32 %v1847_v55, %v549_v49  ;;  %v3950_v58 = vadd.f32 %v2019_v56, %v557_v50  ;;  %v1849_v59 = vpop.f32.mrb[2].mxu0  ;;  %v2021_v60 = vpop.f32.mrb[2].mxu1 }
 0x230   : > { %v3947_v61 = vadd.f32 %v1849_v59, %v545_v47  ;;  %v3951_v62 = vadd.f32 %v2021_v60, %v553_v48  ;;  %v1851_v63 = vpop.f32.mrb[3].mxu0  ;;  %v2023_v0 = vpop.f32.mrb[3].mxu1  ;;  %v2026_v3 = vmax.f32 %v3945_v53, 0.0  ;;  %v2028_v4 = vmax.f32 %v3949_v54, 0.0 }
 0x231   : > { %v3948_v1 = vadd.f32 %v1851_v63, %v549_v49  ;;  %v3952_v2 = vadd.f32 %v2023_v0, %v557_v50  ;;  %v2027_v7 = vmax.f32 %v3946_v57, 0.0  ;;  %v2029_v8 = vmax.f32 %v3950_v58, 0.0 }
 0x232   : > { %v2030_v5 = vmax.f32 %v3947_v61, 0.0  ;;  %v2032_v6 = vmax.f32 %v3951_v62, 0.0 }
 0x233   : > { %v2031_v9 = vmax.f32 %v3948_v1, 0.0  ;;  %v2033_v10 = vmax.f32 %v3952_v2, 0.0 }
 0x234   : > { %v2034_v11 = vpack.c.bf16 %v2030_v5, %v2026_v3  ;;  %v2036_v12 = vpack.c.bf16 %v2032_v6, %v2028_v4 }
 0x235   : > { %v2035_v13 = vpack.c.bf16 %v2031_v9, %v2027_v7  ;;  %v2037_v14 = vpack.c.bf16 %v2033_v10, %v2029_v8 }
 0x236   : > { %2038 = vst [vmem:[#allocation2] sm:$0xff] %v2034_v11  ;;  %2040 = vst [vmem:[#allocation2 + $0x10] sm:$0xff] %v2036_v12 }
 0x237   : > { %2039 = vst [vmem:[#allocation2 + $0x8] sm:$0xff] %v2035_v13  ;;  %2041 = vst [vmem:[#allocation2 + $0x18] sm:$0xff] %v2037_v14 }
 0x238 PF: > { %p2042_p9 = scmp.gt.s32.totalorder %s4803_s21, 0 }
 0x23a   : > { %p2044_p11 = pnand %p2042_p9, %p267_p2 }
 0x23b   : > { %v4388_v15 = vld [vmem:[#allocation6 + $0x4] ss:$16 sps:$4 sm:$0xff] (!%p2044_p11)   ;;  %v4390_v16 = vld [vmem:[#allocation6 + $0xc] ss:$16 sps:$4 sm:$0xff] (!%p2044_p11)   ;;  %v4392_v17 = vld [vmem:[#allocation6] ss:$16 sps:$4 sm:$0xff] (!%p2044_p11)  }
 0x23c   : > { %2047 = sbr.rel (%p2044_p11) target bundleno = 922 (0x39a), region = 57  ;;  %2842 = vmatprep.subr.bf16.mxu0 (!%p2044_p11), %v4388_v15  ;;  %v4393_v18 = vld [vmem:[#allocation6 + $0x8] ss:$16 sps:$4 sm:$0xff] (!%p2044_p11)   ;;  %2928 = vmatprep.subr.bf16.mxu1 (!%p2044_p11), %v4390_v16  ;;  %v4394_v19 = vld [vmem:[#allocation6 + $0x24] ss:$16 sps:$4 sm:$0xff] (!%p2044_p11)  }
 0x23d   : > { %2843 = vmatpush1.bf16.msra.mxu0 (!%p2044_p11), %v4392_v17  ;;  %2929 = vmatpush1.bf16.msra.mxu1 (!%p2044_p11), %v4393_v18  ;;  %v4396_v20 = vld [vmem:[#allocation6 + $0x2c] ss:$16 sps:$4 sm:$0xff] (!%p2044_p11)   ;;  %v4398_v21 = vld [vmem:[#allocation6 + $0x20] ss:$16 sps:$4 sm:$0xff] (!%p2044_p11)   ;;  %v4399_v22 = vld [vmem:[#allocation6 + $0x28] ss:$16 sps:$4 sm:$0xff] (!%p2044_p11)  }
 0x23e   : > { %2844 = vmatprep.subr.bf16.mxu0 (!%p2044_p11), %v4394_v19  ;;  %2930 = vmatprep.subr.bf16.mxu1 (!%p2044_p11), %v4396_v20  ;;  %v4400_v23 = vld [vmem:[#allocation6 + $0x44] ss:$16 sps:$4 sm:$0xff] (!%p2044_p11)   ;;  %v4402_v24 = vld [vmem:[#allocation6 + $0x4c] ss:$16 sps:$4 sm:$0xff] (!%p2044_p11)   ;;  %v4404_v25 = vld [vmem:[#allocation6 + $0x40] ss:$16 sps:$4 sm:$0xff] (!%p2044_p11)  }
 0x23f   : > { %v4405_v26 = vld [vmem:[#allocation6 + $0x48] ss:$16 sps:$4 sm:$0xff] (!%p2044_p11)   ;;  %v4406_v27 = vld [vmem:[#allocation6 + $0x64] ss:$16 sps:$4 sm:$0xff] (!%p2044_p11)   ;;  %v4408_v28 = vld [vmem:[#allocation6 + $0x6c] ss:$16 sps:$4 sm:$0xff] (!%p2044_p11)  }
 0x240   : > { %v4410_v29 = vld [vmem:[#allocation6 + $0x60] ss:$16 sps:$4 sm:$0xff] (!%p2044_p11)   ;;  %v4411_v30 = vld [vmem:[#allocation6 + $0x68] ss:$16 sps:$4 sm:$0xff] (!%p2044_p11)   ;;  %v4412_v31 = vld [vmem:[#allocation6 + $0x84] ss:$16 sps:$4 sm:$0xff] (!%p2044_p11)  }
 0x241   : > { %2845 = vmatpush1.bf16.msra.mxu0 (!%p2044_p11), %v4398_v21  ;;  %2931 = vmatpush1.bf16.msra.mxu1 (!%p2044_p11), %v4399_v22  ;;  %v4414_v32 = vld [vmem:[#allocation6 + $0x8c] ss:$16 sps:$4 sm:$0xff] (!%p2044_p11)   ;;  %v4416_v33 = vld [vmem:[#allocation6 + $0x80] ss:$16 sps:$4 sm:$0xff] (!%p2044_p11)   ;;  %v4417_v34 = vld [vmem:[#allocation6 + $0x88] ss:$16 sps:$4 sm:$0xff] (!%p2044_p11)  }
 0x242   : > { %2846 = vmatprep.subr.bf16.mxu0 (!%p2044_p11), %v4400_v23  ;;  %2932 = vmatprep.subr.bf16.mxu1 (!%p2044_p11), %v4402_v24  ;;  %v4418_v35 = vld [vmem:[#allocation6 + $0xa4] ss:$16 sps:$4 sm:$0xff] (!%p2044_p11)   ;;  %v4420_v36 = vld [vmem:[#allocation6 + $0xac] ss:$16 sps:$4 sm:$0xff] (!%p2044_p11)   ;;  %v4422_v37 = vld [vmem:[#allocation6 + $0xa0] ss:$16 sps:$4 sm:$0xff] (!%p2044_p11)  }
 0x243   : > { %v4423_v38 = vld [vmem:[#allocation6 + $0xa8] ss:$16 sps:$4 sm:$0xff]   ;;  %v4424_v39 = vld [vmem:[#allocation6 + $0xc4] ss:$16 sps:$4 sm:$0xff]   ;;  %v4426_v40 = vld [vmem:[#allocation6 + $0xcc] ss:$16 sps:$4 sm:$0xff]  }
 0x244   : > { %v4428_v41 = vld [vmem:[#allocation6 + $0xc0] ss:$16 sps:$4 sm:$0xff]   ;;  %v4429_v42 = vld [vmem:[#allocation6 + $0xc8] ss:$16 sps:$4 sm:$0xff]   ;;  %v4430_v43 = vld [vmem:[#allocation6 + $0xe4] ss:$16 sps:$4 sm:$0xff]  }
 0x245   : > { %2847 = vmatpush1.bf16.msra.mxu0 %v4404_v25  ;;  %2933 = vmatpush1.bf16.msra.mxu1 %v4405_v26  ;;  %v4432_v44 = vld [vmem:[#allocation6 + $0xec] ss:$16 sps:$4 sm:$0xff]   ;;  %v4434_v45 = vld [vmem:[#allocation6 + $0xe0] ss:$16 sps:$4 sm:$0xff]   ;;  %v4435_v46 = vld [vmem:[#allocation6 + $0xe8] ss:$16 sps:$4 sm:$0xff]  }
 0x246   : > { %2848 = vmatprep.subr.bf16.mxu0 %v4406_v27  ;;  %2934 = vmatprep.subr.bf16.mxu1 %v4408_v28  ;;  %v4436_v47 = vld [vmem:[#allocation6 + $0x104] ss:$16 sps:$4 sm:$0xff]   ;;  %v4438_v48 = vld [vmem:[#allocation6 + $0x10c] ss:$16 sps:$4 sm:$0xff]   ;;  %v4440_v49 = vld [vmem:[#allocation6 + $0x100] ss:$16 sps:$4 sm:$0xff]  }
 0x247   : > { %v4441_v50 = vld [vmem:[#allocation6 + $0x108] ss:$16 sps:$4 sm:$0xff]   ;;  %v4442_v51 = vld [vmem:[#allocation6 + $0x124] ss:$16 sps:$4 sm:$0xff]   ;;  %v4444_v52 = vld [vmem:[#allocation6 + $0x12c] ss:$16 sps:$4 sm:$0xff]  }
 0x248   : > { %v4446_v53 = vld [vmem:[#allocation6 + $0x120] ss:$16 sps:$4 sm:$0xff]   ;;  %v4447_v54 = vld [vmem:[#allocation6 + $0x128] ss:$16 sps:$4 sm:$0xff]   ;;  %v4448_v55 = vld [vmem:[#allocation6 + $0x144] ss:$16 sps:$4 sm:$0xff]  }
 0x249   : > { %2849 = vmatpush1.bf16.msra.mxu0 %v4410_v29  ;;  %2935 = vmatpush1.bf16.msra.mxu1 %v4411_v30  ;;  %v4450_v56 = vld [vmem:[#allocation6 + $0x14c] ss:$16 sps:$4 sm:$0xff]   ;;  %v4452_v57 = vld [vmem:[#allocation6 + $0x140] ss:$16 sps:$4 sm:$0xff]   ;;  %v4453_v58 = vld [vmem:[#allocation6 + $0x148] ss:$16 sps:$4 sm:$0xff]  }
 0x24a   : > { %2850 = vmatprep.subr.bf16.mxu0 %v4412_v31  ;;  %2936 = vmatprep.subr.bf16.mxu1 %v4414_v32  ;;  %v4454_v59 = vld [vmem:[#allocation6 + $0x164] ss:$16 sps:$4 sm:$0xff]   ;;  %v4456_v60 = vld [vmem:[#allocation6 + $0x16c] ss:$16 sps:$4 sm:$0xff]   ;;  %v4458_v62 = vld [vmem:[#allocation6 + $0x160] ss:$16 sps:$4 sm:$0xff]  }
 0x24b   : > { %v2049_v61 = vld [vmem:[#allocation2 + $0x8] sm:$0xff]  ;;  %v4459_v63 = vld [vmem:[#allocation6 + $0x168] ss:$16 sps:$4 sm:$0xff]   ;;  %v4462_v1 = vld [vmem:[#allocation6 + $0x18c] ss:$16 sps:$4 sm:$0xff]  }
 0x24c   : > { %2874 = vmatprep.mubr.bf16.mxu0 %v2049_v61  ;;  %2960 = vmatprep.mubr.bf16.mxu1 %v2049_v61  ;;  %v4460_v0 = vld [vmem:[#allocation6 + $0x184] ss:$16 sps:$4 sm:$0xff]   ;;  %v4464_v2 = vld [vmem:[#allocation6 + $0x180] ss:$16 sps:$4 sm:$0xff]   ;;  %v4465_v3 = vld [vmem:[#allocation6 + $0x188] ss:$16 sps:$4 sm:$0xff]  }
 0x24d   : > { %2851 = vmatpush1.bf16.msra.mxu0 %v4416_v33  ;;  %2937 = vmatpush1.bf16.msra.mxu1 %v4417_v34  ;;  %v4466_v4 = vld [vmem:[#allocation6 + $0x1a4] ss:$16 sps:$4 sm:$0xff]   ;;  %v4468_v5 = vld [vmem:[#allocation6 + $0x1ac] ss:$16 sps:$4 sm:$0xff]   ;;  %v4470_v6 = vld [vmem:[#allocation6 + $0x1a0] ss:$16 sps:$4 sm:$0xff]  }
 0x24e   : > { %2852 = vmatprep.subr.bf16.mxu0 %v4418_v35  ;;  %2938 = vmatprep.subr.bf16.mxu1 %v4420_v36  ;;  %v4471_v7 = vld [vmem:[#allocation6 + $0x1a8] ss:$16 sps:$4 sm:$0xff]   ;;  %v4472_v8 = vld [vmem:[#allocation6 + $0x1c4] ss:$16 sps:$4 sm:$0xff]   ;;  %v4474_v9 = vld [vmem:[#allocation6 + $0x1cc] ss:$16 sps:$4 sm:$0xff]  }
 0x24f   : > { %v4476_v10 = vld [vmem:[#allocation6 + $0x1c0] ss:$16 sps:$4 sm:$0xff]   ;;  %v4477_v11 = vld [vmem:[#allocation6 + $0x1c8] ss:$16 sps:$4 sm:$0xff]   ;;  %v4478_v12 = vld [vmem:[#allocation6 + $0x1e4] ss:$16 sps:$4 sm:$0xff]  }
 0x250   : > { %v4480_v13 = vld [vmem:[#allocation6 + $0x1ec] ss:$16 sps:$4 sm:$0xff]   ;;  %v4482_v14 = vld [vmem:[#allocation6 + $0x1e0] ss:$16 sps:$4 sm:$0xff]   ;;  %v4483_v15 = vld [vmem:[#allocation6 + $0x1e8] ss:$16 sps:$4 sm:$0xff]  }
 0x251   : > { %2853 = vmatpush1.bf16.msra.mxu0 %v4422_v37  ;;  %2939 = vmatpush1.bf16.msra.mxu1 %v4423_v38  ;;  %v4486_v16 = vld [vmem:[#allocation6 + $0x204] ss:$16 sps:$4 sm:$0xff]   ;;  %v4489_v17 = vld [vmem:[#allocation6 + $0x20c] ss:$16 sps:$4 sm:$0xff]   ;;  %v4484_v18 = vld [vmem:[#allocation6 + $0x200] ss:$16 sps:$4 sm:$0xff]  }
 0x252   : > { %2854 = vmatprep.subr.bf16.mxu0 %v4424_v39  ;;  %2940 = vmatprep.subr.bf16.mxu1 %v4426_v40  ;;  %v4487_v19 = vld [vmem:[#allocation6 + $0x208] ss:$16 sps:$4 sm:$0xff]   ;;  %v4492_v21 = vld [vmem:[#allocation6 + $0x224] ss:$16 sps:$4 sm:$0xff]   ;;  %v4495_v22 = vld [vmem:[#allocation6 + $0x22c] ss:$16 sps:$4 sm:$0xff]  }
 0x253   : > { %v2048_v20 = vld [vmem:[#allocation2] sm:$0xff]  ;;  %v4490_v23 = vld [vmem:[#allocation6 + $0x220] ss:$16 sps:$4 sm:$0xff]   ;;  %v4498_v25 = vld [vmem:[#allocation6 + $0x244] ss:$16 sps:$4 sm:$0xff]  }
 0x254   : > { %v4493_v24 = vld [vmem:[#allocation6 + $0x228] ss:$16 sps:$4 sm:$0xff]   ;;  %v4501_v26 = vld [vmem:[#allocation6 + $0x24c] ss:$16 sps:$4 sm:$0xff]   ;;  %v4496_v27 = vld [vmem:[#allocation6 + $0x240] ss:$16 sps:$4 sm:$0xff]  }
 0x255   : > { %2855 = vmatpush1.bf16.msra.mxu0 %v4428_v41  ;;  %2941 = vmatpush1.bf16.msra.mxu1 %v4429_v42  ;;  %v4499_v28 = vld [vmem:[#allocation6 + $0x248] ss:$16 sps:$4 sm:$0xff]   ;;  %v4504_v29 = vld [vmem:[#allocation6 + $0x264] ss:$16 sps:$4 sm:$0xff]   ;;  %v4507_v30 = vld [vmem:[#allocation6 + $0x26c] ss:$16 sps:$4 sm:$0xff]  }
 0x256   : > { %2856 = vmatprep.subr.bf16.mxu0 %v4430_v43  ;;  %2942 = vmatprep.subr.bf16.mxu1 %v4432_v44  ;;  %v4502_v31 = vld [vmem:[#allocation6 + $0x260] ss:$16 sps:$4 sm:$0xff]   ;;  %v4505_v32 = vld [vmem:[#allocation6 + $0x268] ss:$16 sps:$4 sm:$0xff]   ;;  %v4510_v33 = vld [vmem:[#allocation6 + $0x284] ss:$16 sps:$4 sm:$0xff]  }
 0x257   : > { %v4513_v34 = vld [vmem:[#allocation6 + $0x28c] ss:$16 sps:$4 sm:$0xff]   ;;  %v4508_v35 = vld [vmem:[#allocation6 + $0x280] ss:$16 sps:$4 sm:$0xff]   ;;  %v4511_v36 = vld [vmem:[#allocation6 + $0x288] ss:$16 sps:$4 sm:$0xff]  }
 0x258   : > { %v4516_v37 = vld [vmem:[#allocation6 + $0x2a4] ss:$16 sps:$4 sm:$0xff]   ;;  %v4519_v38 = vld [vmem:[#allocation6 + $0x2ac] ss:$16 sps:$4 sm:$0xff]   ;;  %v4514_v39 = vld [vmem:[#allocation6 + $0x2a0] ss:$16 sps:$4 sm:$0xff]  }
 0x259   : > { %2857 = vmatpush1.bf16.msra.mxu0 %v4434_v45  ;;  %2943 = vmatpush1.bf16.msra.mxu1 %v4435_v46  ;;  %v4517_v40 = vld [vmem:[#allocation6 + $0x2a8] ss:$16 sps:$4 sm:$0xff]   ;;  %v4522_v41 = vld [vmem:[#allocation6 + $0x2c4] ss:$16 sps:$4 sm:$0xff]   ;;  %v4525_v42 = vld [vmem:[#allocation6 + $0x2cc] ss:$16 sps:$4 sm:$0xff]  }
 0x25a   : > { %2858 = vmatprep.subr.bf16.mxu0 %v4436_v47  ;;  %2944 = vmatprep.subr.bf16.mxu1 %v4438_v48  ;;  %v2051_v43 = vld [vmem:[#allocation2 + $0x18] sm:$0xff]  ;;  %v4523_v45 = vld [vmem:[#allocation6 + $0x2c8] ss:$16 sps:$4 sm:$0xff]   ;;  %v4531_v47 = vld [vmem:[#allocation6 + $0x2ec] ss:$16 sps:$4 sm:$0xff]  }
 0x25b   : > { %v4520_v44 = vld [vmem:[#allocation6 + $0x2c0] ss:$16 sps:$4 sm:$0xff]   ;;  %v4528_v46 = vld [vmem:[#allocation6 + $0x2e4] ss:$16 sps:$4 sm:$0xff]   ;;  %v4547_v61 = vld [vmem:[#allocation6 + $0x348] ss:$16 sps:$4 sm:$0xff]  }
 0x25c   : > { %v4526_v48 = vld [vmem:[#allocation6 + $0x2e0] ss:$16 sps:$4 sm:$0xff]  }
 0x25d   : > { %2859 = vmatpush1.bf16.msra.mxu0 %v4440_v49  ;;  %2945 = vmatpush1.bf16.msra.mxu1 %v4441_v50  ;;  %v4529_v49 = vld [vmem:[#allocation6 + $0x2e8] ss:$16 sps:$4 sm:$0xff]   ;;  %v4534_v50 = vld [vmem:[#allocation6 + $0x304] ss:$16 sps:$4 sm:$0xff]  }
 0x25e   : > { %2860 = vmatprep.subr.bf16.mxu0 %v4442_v51  ;;  %2946 = vmatprep.subr.bf16.mxu1 %v4444_v52  ;;  %v4537_v51 = vld [vmem:[#allocation6 + $0x30c] ss:$16 sps:$4 sm:$0xff]   ;;  %v4532_v52 = vld [vmem:[#allocation6 + $0x300] ss:$16 sps:$4 sm:$0xff]  }
 0x261   : > { %2861 = vmatpush1.bf16.msra.mxu0 %v4446_v53  ;;  %2947 = vmatpush1.bf16.msra.mxu1 %v4447_v54  ;;  %v4535_v53 = vld [vmem:[#allocation6 + $0x308] ss:$16 sps:$4 sm:$0xff]   ;;  %v4540_v54 = vld [vmem:[#allocation6 + $0x324] ss:$16 sps:$4 sm:$0xff]  }
 0x262   : > { %2862 = vmatprep.subr.bf16.mxu0 %v4448_v55  ;;  %2948 = vmatprep.subr.bf16.mxu1 %v4450_v56  ;;  %v4543_v55 = vld [vmem:[#allocation6 + $0x32c] ss:$16 sps:$4 sm:$0xff]   ;;  %v4538_v56 = vld [vmem:[#allocation6 + $0x320] ss:$16 sps:$4 sm:$0xff]  }
 0x265   : > { %2863 = vmatpush1.bf16.msra.mxu0 %v4452_v57  ;;  %2949 = vmatpush1.bf16.msra.mxu1 %v4453_v58  ;;  %v4541_v57 = vld [vmem:[#allocation6 + $0x328] ss:$16 sps:$4 sm:$0xff]   ;;  %v4546_v58 = vld [vmem:[#allocation6 + $0x344] ss:$16 sps:$4 sm:$0xff]  }
 0x266   : > { %2864 = vmatprep.subr.bf16.mxu0 %v4454_v59  ;;  %2950 = vmatprep.subr.bf16.mxu1 %v4456_v60  ;;  %v4549_v59 = vld [vmem:[#allocation6 + $0x34c] ss:$16 sps:$4 sm:$0xff]   ;;  %v4544_v60 = vld [vmem:[#allocation6 + $0x340] ss:$16 sps:$4 sm:$0xff]  }
 0x269   : > { %2865 = vmatpush1.bf16.msra.mxu0 %v4458_v62  ;;  %2951 = vmatpush1.bf16.msra.mxu1 %v4459_v63  ;;  %v4552_v62 = vld [vmem:[#allocation6 + $0x364] ss:$16 sps:$4 sm:$0xff]   ;;  %v4555_v63 = vld [vmem:[#allocation6 + $0x36c] ss:$16 sps:$4 sm:$0xff]  }
 0x26a   : > { %2866 = vmatprep.subr.bf16.mxu0 %v4460_v0  ;;  %2952 = vmatprep.subr.bf16.mxu1 %v4462_v1  ;;  %v4550_v0 = vld [vmem:[#allocation6 + $0x360] ss:$16 sps:$4 sm:$0xff]   ;;  %v4553_v1 = vld [vmem:[#allocation6 + $0x368] ss:$16 sps:$4 sm:$0xff]  }
 0x26d   : > { %2867 = vmatpush1.bf16.msra.mxu0 %v4464_v2  ;;  %2953 = vmatpush1.bf16.msra.mxu1 %v4465_v3  ;;  %v4558_v2 = vld [vmem:[#allocation6 + $0x384] ss:$16 sps:$4 sm:$0xff]   ;;  %v4561_v3 = vld [vmem:[#allocation6 + $0x38c] ss:$16 sps:$4 sm:$0xff]  }
 0x26e   : > { %2868 = vmatprep.subr.bf16.mxu0 %v4466_v4  ;;  %2954 = vmatprep.subr.bf16.mxu1 %v4468_v5  ;;  %v4556_v4 = vld [vmem:[#allocation6 + $0x380] ss:$16 sps:$4 sm:$0xff]   ;;  %v4559_v5 = vld [vmem:[#allocation6 + $0x388] ss:$16 sps:$4 sm:$0xff]  }
 0x271   : > { %2869 = vmatpush1.bf16.msra.mxu0 %v4470_v6  ;;  %2955 = vmatpush1.bf16.msra.mxu1 %v4471_v7  ;;  %v4564_v6 = vld [vmem:[#allocation6 + $0x3a4] ss:$16 sps:$4 sm:$0xff]   ;;  %v4567_v7 = vld [vmem:[#allocation6 + $0x3ac] ss:$16 sps:$4 sm:$0xff]  }
 0x272   : > { %2870 = vmatprep.subr.bf16.mxu0 %v4472_v8  ;;  %2956 = vmatprep.subr.bf16.mxu1 %v4474_v9  ;;  %v4562_v8 = vld [vmem:[#allocation6 + $0x3a0] ss:$16 sps:$4 sm:$0xff]   ;;  %v4565_v9 = vld [vmem:[#allocation6 + $0x3a8] ss:$16 sps:$4 sm:$0xff]  }
 0x275   : > { %2871 = vmatpush1.bf16.msra.mxu0 %v4476_v10  ;;  %2957 = vmatpush1.bf16.msra.mxu1 %v4477_v11  ;;  %v4570_v10 = vld [vmem:[#allocation6 + $0x3c4] ss:$16 sps:$4 sm:$0xff]   ;;  %v4573_v11 = vld [vmem:[#allocation6 + $0x3cc] ss:$16 sps:$4 sm:$0xff]  }
 0x276   : > { %2872 = vmatprep.subr.bf16.mxu0 %v4478_v12  ;;  %2958 = vmatprep.subr.bf16.mxu1 %v4480_v13  ;;  %v4568_v12 = vld [vmem:[#allocation6 + $0x3c0] ss:$16 sps:$4 sm:$0xff]   ;;  %v4571_v13 = vld [vmem:[#allocation6 + $0x3c8] ss:$16 sps:$4 sm:$0xff]  }
 0x279   : > { %2873 = vmatpush1.bf16.msra.mxu0 %v4482_v14  ;;  %2959 = vmatpush1.bf16.msra.mxu1 %v4483_v15  ;;  %v4576_v14 = vld [vmem:[#allocation6 + $0x3e4] ss:$16 sps:$4 sm:$0xff]   ;;  %v4579_v15 = vld [vmem:[#allocation6 + $0x3ec] ss:$16 sps:$4 sm:$0xff]  }
 0x27a   : > { %2885 = vmatprep.subr.bf16.mxu0 %v4486_v16  ;;  %2971 = vmatprep.subr.bf16.mxu1 %v4489_v17  ;;  %v4574_v16 = vld [vmem:[#allocation6 + $0x3e0] ss:$16 sps:$4 sm:$0xff]   ;;  %v4577_v17 = vld [vmem:[#allocation6 + $0x3e8] ss:$16 sps:$4 sm:$0xff]  }
 0x27c   : > { %2875 = vmatmul.mubr.bf16.vlgmr.msra.gmra.mrb[0].mxu0 %v2048_v20  ;;  %2961 = vmatmul.mubr.bf16.vlgmr.msra.gmra.mrb[0].mxu1 %v2048_v20 }
 0x27d   : > { %2886 = vmatpush1.bf16.msra.mxu0 %v4484_v18  ;;  %2972 = vmatpush1.bf16.msra.mxu1 %v4487_v19  ;;  %v2050_v18 = vld [vmem:[#allocation2 + $0x10] sm:$0xff]  ;;  %v2182_v19 = vlaneseq }
 0x27e   : > { %2887 = vmatprep.subr.bf16.mxu0 %v4492_v21  ;;  %2973 = vmatprep.subr.bf16.mxu1 %v4495_v22 }
 0x27f   : > { %2917 = vmatprep.mubr.bf16.mxu0 %v2051_v43  ;;  %3003 = vmatprep.mubr.bf16.mxu1 %v2051_v43  ;;  %v2183_v20 = vshrl.u32 %v2182_v19, 7 }
 0x281   : > { %2888 = vmatpush1.bf16.msra.mxu0 %v4490_v23  ;;  %2974 = vmatpush1.bf16.msra.mxu1 %v4493_v24  ;;  %v2184_v21 = vsub.s32 0, %v2183_v20  ;;  %v2192_v22 = vsub.s32 2, %v2183_v20  ;;  %v2180_v23 = vld [vmem:[%s4932_s29] sm:$0xf]  ;;  %v2188_v24 = vsub.s32 1, %v2183_v20 }
 0x282   : > { %2889 = vmatprep.subr.bf16.mxu0 %v4498_v25  ;;  %2975 = vmatprep.subr.bf16.mxu1 %v4501_v26  ;;  %v2196_v25 = vsub.s32 3, %v2183_v20 }
 0x283   : > { %v2185_v26 = vrot.slane %v2180_v23, %v2184_v21 }
 0x285   : > { %2890 = vmatpush1.bf16.msra.mxu0 %v4496_v27  ;;  %2976 = vmatpush1.bf16.msra.mxu1 %v4499_v28  ;;  %v2193_v27 = vrot.slane %v2180_v23, %v2192_v22  ;;  %v2189_v28 = vrot.slane %v2180_v23, %v2188_v24 }
 0x286   : > { %2891 = vmatprep.subr.bf16.mxu0 %v4504_v29  ;;  %2977 = vmatprep.subr.bf16.mxu1 %v4507_v30  ;;  %v2197_v29 = vrot.slane %v2180_v23, %v2196_v25 }
 0x289   : > { %2892 = vmatpush1.bf16.msra.mxu0 %v4502_v31  ;;  %2978 = vmatpush1.bf16.msra.mxu1 %v4505_v32 }
 0x28a   : > { %2893 = vmatprep.subr.bf16.mxu0 %v4510_v33  ;;  %2979 = vmatprep.subr.bf16.mxu1 %v4513_v34 }
 0x28d   : > { %2894 = vmatpush1.bf16.msra.mxu0 %v4508_v35  ;;  %2980 = vmatpush1.bf16.msra.mxu1 %v4511_v36 }
 0x28e   : > { %2895 = vmatprep.subr.bf16.mxu0 %v4516_v37  ;;  %2981 = vmatprep.subr.bf16.mxu1 %v4519_v38 }
 0x291   : > { %2896 = vmatpush1.bf16.msra.mxu0 %v4514_v39  ;;  %2982 = vmatpush1.bf16.msra.mxu1 %v4517_v40 }
 0x292   : > { %2897 = vmatprep.subr.bf16.mxu0 %v4522_v41  ;;  %2983 = vmatprep.subr.bf16.mxu1 %v4525_v42 }
 0x295   : > { %2898 = vmatpush1.bf16.msra.mxu0 %v4520_v44  ;;  %2984 = vmatpush1.bf16.msra.mxu1 %v4523_v45 }
 0x296   : > { %2899 = vmatprep.subr.bf16.mxu0 %v4528_v46  ;;  %2985 = vmatprep.subr.bf16.mxu1 %v4531_v47 }
 0x299   : > { %2900 = vmatpush1.bf16.msra.mxu0 %v4526_v48  ;;  %2986 = vmatpush1.bf16.msra.mxu1 %v4529_v49 }
 0x29a   : > { %2901 = vmatprep.subr.bf16.mxu0 %v4534_v50  ;;  %2987 = vmatprep.subr.bf16.mxu1 %v4537_v51 }
 0x29d   : > { %2902 = vmatpush1.bf16.msra.mxu0 %v4532_v52  ;;  %2988 = vmatpush1.bf16.msra.mxu1 %v4535_v53 }
 0x29e   : > { %2903 = vmatprep.subr.bf16.mxu0 %v4540_v54  ;;  %2989 = vmatprep.subr.bf16.mxu1 %v4543_v55 }
 0x2a1   : > { %2904 = vmatpush1.bf16.msra.mxu0 %v4538_v56  ;;  %2990 = vmatpush1.bf16.msra.mxu1 %v4541_v57 }
 0x2a2   : > { %2905 = vmatprep.subr.bf16.mxu0 %v4546_v58  ;;  %2991 = vmatprep.subr.bf16.mxu1 %v4549_v59 }
 0x2a5   : > { %2906 = vmatpush1.bf16.msra.mxu0 %v4544_v60  ;;  %2992 = vmatpush1.bf16.msra.mxu1 %v4547_v61 }
 0x2a6   : > { %2907 = vmatprep.subr.bf16.mxu0 %v4552_v62  ;;  %2993 = vmatprep.subr.bf16.mxu1 %v4555_v63 }
 0x2a9   : > { %2908 = vmatpush1.bf16.msra.mxu0 %v4550_v0  ;;  %2994 = vmatpush1.bf16.msra.mxu1 %v4553_v1 }
 0x2aa   : > { %2909 = vmatprep.subr.bf16.mxu0 %v4558_v2  ;;  %2995 = vmatprep.subr.bf16.mxu1 %v4561_v3 }
 0x2ad   : > { %2910 = vmatpush1.bf16.msra.mxu0 %v4556_v4  ;;  %2996 = vmatpush1.bf16.msra.mxu1 %v4559_v5 }
 0x2ae   : > { %2911 = vmatprep.subr.bf16.mxu0 %v4564_v6  ;;  %2997 = vmatprep.subr.bf16.mxu1 %v4567_v7 }
 0x2b1   : > { %2912 = vmatpush1.bf16.msra.mxu0 %v4562_v8  ;;  %2998 = vmatpush1.bf16.msra.mxu1 %v4565_v9 }
 0x2b2   : > { %2913 = vmatprep.subr.bf16.mxu0 %v4570_v10  ;;  %2999 = vmatprep.subr.bf16.mxu1 %v4573_v11 }
 0x2b5   : > { %2914 = vmatpush1.bf16.msra.mxu0 %v4568_v12  ;;  %3000 = vmatpush1.bf16.msra.mxu1 %v4571_v13 }
 0x2b6   : > { %2915 = vmatprep.subr.bf16.mxu0 %v4576_v14  ;;  %3001 = vmatprep.subr.bf16.mxu1 %v4579_v15 }
 0x2b9   : > { %2916 = vmatpush1.bf16.msra.mxu0 %v4574_v16  ;;  %3002 = vmatpush1.bf16.msra.mxu1 %v4577_v17 }
 0x2bc   : > { %2918 = vmatmul.mubr.bf16.vlgmr.msra.gmra.mrb[0].mxu0 %v2050_v18  ;;  %3004 = vmatmul.mubr.bf16.vlgmr.msra.gmra.mrb[0].mxu1 %v2050_v18 }
 0x38f   : > { %v2919_v30 = vpop.f32.mrb[0].mxu0  ;;  %v3005_v31 = vpop.f32.mrb[0].mxu1 }
 0x390   : > { %v3977_v32 = vadd.f32 %v2919_v30, %v2185_v26  ;;  %v3981_v33 = vadd.f32 %v3005_v31, %v2193_v27  ;;  %v2921_v34 = vpop.f32.mrb[1].mxu0  ;;  %v3007_v35 = vpop.f32.mrb[1].mxu1 }
 0x391   : > { %v3978_v36 = vadd.f32 %v2921_v34, %v2189_v28  ;;  %v3982_v37 = vadd.f32 %v3007_v35, %v2197_v29  ;;  %v2923_v38 = vpop.f32.mrb[2].mxu0  ;;  %v3009_v39 = vpop.f32.mrb[2].mxu1 }
 0x392   : > { %v3979_v40 = vadd.f32 %v2923_v38, %v2185_v26  ;;  %v3983_v41 = vadd.f32 %v3009_v39, %v2193_v27  ;;  %v2925_v42 = vpop.f32.mrb[3].mxu0  ;;  %v3011_v43 = vpop.f32.mrb[3].mxu1  ;;  %v3014_v46 = vmax.f32 %v3977_v32, 0.0  ;;  %v3016_v47 = vmax.f32 %v3981_v33, 0.0 }
 0x393   : > { %v3980_v44 = vadd.f32 %v2925_v42, %v2189_v28  ;;  %v3984_v45 = vadd.f32 %v3011_v43, %v2197_v29  ;;  %v3015_v50 = vmax.f32 %v3978_v36, 0.0  ;;  %v3017_v51 = vmax.f32 %v3982_v37, 0.0 }
 0x394   : > { %v3018_v48 = vmax.f32 %v3979_v40, 0.0  ;;  %v3020_v49 = vmax.f32 %v3983_v41, 0.0 }
 0x395   : > { %v3019_v52 = vmax.f32 %v3980_v44, 0.0  ;;  %v3021_v53 = vmax.f32 %v3984_v45, 0.0 }
 0x396   : > { %v3022_v54 = vpack.c.bf16 %v3018_v48, %v3014_v46  ;;  %v3024_v55 = vpack.c.bf16 %v3020_v49, %v3016_v47 }
 0x397   : > { %v3023_v56 = vpack.c.bf16 %v3019_v52, %v3015_v50  ;;  %v3025_v57 = vpack.c.bf16 %v3021_v53, %v3017_v51 }
 0x398   : > { %3026 = vst [vmem:[#allocation2] sm:$0xff] %v3022_v54  ;;  %3028 = vst [vmem:[#allocation2 + $0x10] sm:$0xff] %v3024_v55 }
 0x399   : > { %3027 = vst [vmem:[#allocation2 + $0x8] sm:$0xff] %v3023_v56  ;;  %3029 = vst [vmem:[#allocation2 + $0x18] sm:$0xff] %v3025_v57 }
 0x39a PF: > { %p3863_p1 = scmp.ne.s32.totalorder %s4803_s21, 2 }
 0x39b   : > { %v4580_v58 = vld [vmem:[#allocation8 + $0x40] sm:$0xff] (!%p3863_p1)   ;;  %v4584_v62 = vld [vmem:[#allocation8 + $0x48] sm:$0xff] (!%p3863_p1)   ;;  %v4588_v2 = vld [vmem:[#allocation8 + $0x50] sm:$0xff] (!%p3863_p1)  }
 0x39c   : > { %3033 = sbr.rel (%p3863_p1) target bundleno = 1179 (0x49b), region = 61  ;;  %v4581_v59 = vld [vmem:[#allocation8 + $0xc0] sm:$0xff] (!%p3863_p1)   ;;  %3901 = vmatprep.subr.bf16.mxu0 (!%p3863_p1), %v4580_v58  ;;  %v4585_v63 = vld [vmem:[#allocation8 + $0xc8] sm:$0xff] (!%p3863_p1)   ;;  %v4589_v3 = vld [vmem:[#allocation8 + $0xd0] sm:$0xff] (!%p3863_p1)  }
 0x39d   : > { %v4582_v60 = vld [vmem:[#allocation8] sm:$0xff] (!%p3863_p1)   ;;  %3923 = vmatprep.subr.bf16.mxu1 (!%p3863_p1), %v4581_v59  ;;  %v4586_v0 = vld [vmem:[#allocation8 + $0x8] sm:$0xff] (!%p3863_p1)   ;;  %v4590_v4 = vld [vmem:[#allocation8 + $0x10] sm:$0xff] (!%p3863_p1)  }
 0x39e   : > { %v4583_v61 = vld [vmem:[#allocation8 + $0x80] sm:$0xff] (!%p3863_p1)   ;;  %3902 = vmatpush3.bf16.msra.mxu0 (!%p3863_p1), %v4582_v60  ;;  %v4587_v1 = vld [vmem:[#allocation8 + $0x88] sm:$0xff] (!%p3863_p1)   ;;  %v4591_v5 = vld [vmem:[#allocation8 + $0x90] sm:$0xff] (!%p3863_p1)  }
 0x39f   : > { %3924 = vmatpush3.bf16.msra.mxu1 (!%p3863_p1), %v4583_v61  ;;  %3903 = vmatprep.subr.bf16.mxu0 (!%p3863_p1), %v4584_v62  ;;  %v4592_v6 = vld [vmem:[#allocation8 + $0x58] sm:$0xff] (!%p3863_p1)   ;;  %v4596_v10 = vld [vmem:[#allocation8 + $0x60] sm:$0xff] (!%p3863_p1)   ;;  %v4600_v14 = vld [vmem:[#allocation8 + $0x68] sm:$0xff] (!%p3863_p1)  }
 0x3a0   : > { %3925 = vmatprep.subr.bf16.mxu1 (!%p3863_p1), %v4585_v63  ;;  %v4593_v7 = vld [vmem:[#allocation8 + $0xd8] sm:$0xff] (!%p3863_p1)   ;;  %v4597_v11 = vld [vmem:[#allocation8 + $0xe0] sm:$0xff] (!%p3863_p1)   ;;  %v4601_v15 = vld [vmem:[#allocation8 + $0xe8] sm:$0xff] (!%p3863_p1)  }
 0x3a1   : > { %v4594_v8 = vld [vmem:[#allocation8 + $0x18] sm:$0xff] (!%p3863_p1)   ;;  %v4598_v12 = vld [vmem:[#allocation8 + $0x20] sm:$0xff] (!%p3863_p1)   ;;  %v4602_v16 = vld [vmem:[#allocation8 + $0x28] sm:$0xff] (!%p3863_p1)  }
 0x3a2   : > { %3904 = vmatpush3.bf16.msra.mxu0 (!%p3863_p1), %v4586_v0  ;;  %v4595_v9 = vld [vmem:[#allocation8 + $0x98] sm:$0xff] (!%p3863_p1)   ;;  %v4599_v13 = vld [vmem:[#allocation8 + $0xa0] sm:$0xff] (!%p3863_p1)   ;;  %v4603_v17 = vld [vmem:[#allocation8 + $0xa8] sm:$0xff] (!%p3863_p1)  }
 0x3a3   : > { %3926 = vmatpush3.bf16.msra.mxu1 %v4587_v1  ;;  %3905 = vmatprep.subr.bf16.mxu0 %v4588_v2  ;;  %v4604_v18 = vld [vmem:[#allocation8 + $0x70] sm:$0xff]   ;;  %v4608_v22 = vld [vmem:[#allocation8 + $0x78] sm:$0xff]   ;;  %v3037_v27 = vld [vmem:[#allocation2 + $0x18] sm:$0xff] }
 0x3a4   : > { %3927 = vmatprep.subr.bf16.mxu1 %v4589_v3  ;;  %v4605_v19 = vld [vmem:[#allocation8 + $0xf0] sm:$0xff]   ;;  %v4609_v23 = vld [vmem:[#allocation8 + $0xf8] sm:$0xff]   ;;  %v3034_v28 = vld [vmem:[#allocation2] sm:$0xff]  ;;  %3374 = vmatprep.mubr.bf16.mxu1 %v3037_v27 }
 0x3a5   : > { %v4606_v20 = vld [vmem:[#allocation8 + $0x30] sm:$0xff]   ;;  %v4610_v24 = vld [vmem:[#allocation8 + $0x38] sm:$0xff]   ;;  %v3864_v32 = vld [vmem:[%s4932_s29] ss:$0 sm:$0xff] }
 0x3a6   : > { %3906 = vmatpush3.bf16.msra.mxu0 %v4590_v4  ;;  %v4607_v21 = vld [vmem:[#allocation8 + $0xb0] sm:$0xff]   ;;  %v4611_v25 = vld [vmem:[#allocation8 + $0xb8] sm:$0xff]  }
 0x3a7   : > { %3928 = vmatpush3.bf16.msra.mxu1 %v4591_v5  ;;  %3907 = vmatprep.subr.bf16.mxu0 %v4592_v6  ;;  %v3035_v26 = vld [vmem:[#allocation2 + $0x8] sm:$0xff]  ;;  %v3036_v29 = vld [vmem:[#allocation2 + $0x10] sm:$0xff] }
 0x3a8   : > { %3929 = vmatprep.subr.bf16.mxu1 %v4593_v7  ;;  %3333 = vmatprep.mubr.bf16.mxu0 %v3035_v26 }
 0x3aa   : > { %3908 = vmatpush3.bf16.msra.mxu0 %v4594_v8 }
 0x3ab   : > { %3930 = vmatpush3.bf16.msra.mxu1 %v4595_v9  ;;  %3909 = vmatprep.subr.bf16.mxu0 %v4596_v10 }
 0x3ac   : > { %3931 = vmatprep.subr.bf16.mxu1 %v4597_v11 }
 0x3ae   : > { %3910 = vmatpush3.bf16.msra.mxu0 %v4598_v12 }
 0x3af   : > { %3932 = vmatpush3.bf16.msra.mxu1 %v4599_v13  ;;  %3911 = vmatprep.subr.bf16.mxu0 %v4600_v14 }
 0x3b0   : > { %3933 = vmatprep.subr.bf16.mxu1 %v4601_v15 }
 0x3b2   : > { %3912 = vmatpush3.bf16.msra.mxu0 %v4602_v16 }
 0x3b3   : > { %3934 = vmatpush3.bf16.msra.mxu1 %v4603_v17  ;;  %3913 = vmatprep.subr.bf16.mxu0 %v4604_v18 }
 0x3b4   : > { %3935 = vmatprep.subr.bf16.mxu1 %v4605_v19 }
 0x3b6   : > { %3914 = vmatpush3.bf16.msra.mxu0 %v4606_v20 }
 0x3b7   : > { %3936 = vmatpush3.bf16.msra.mxu1 %v4607_v21  ;;  %3915 = vmatprep.subr.bf16.mxu0 %v4608_v22 }
 0x3b8   : > { %3937 = vmatprep.subr.bf16.mxu1 %v4609_v23 }
 0x3ba   : > { %3916 = vmatpush3.bf16.msra.mxu0 %v4610_v24 }
 0x3bb   : > { %3938 = vmatpush3.bf16.msra.mxu1 %v4611_v25 }
 0x3bd   : > { %3334 = vmatmul.mubr.bf16.vlgmr.msra.gmra.mrb[0].mxu0 %v3034_v28 }
 0x3be   : > { %3375 = vmatmul.mubr.bf16.vlgmr.msra.gmra.mrb[0].mxu1 %v3036_v29 }
 0x490   : > { %v3917_v30 = vpop.f32.mrb[0].mxu0 }
 0x491   : > { %v3939_v31 = vpop.f32.mrb[0].mxu1  ;;  %v3918_v33 = vpop.f32.mrb[1].mxu0 }
 0x492   : > { %v3919_v34 = vadd.f32 %v3918_v33, %v3917_v30  ;;  %v3940_v35 = vpop.f32.mrb[1].mxu1  ;;  %v3920_v36 = vpop.f32.mrb[2].mxu0 }
 0x493   : > { %v3941_v37 = vadd.f32 %v3940_v35, %v3939_v31  ;;  %v3942_v38 = vpop.f32.mrb[2].mxu1  ;;  %v3921_v39 = vpop.f32.mrb[3].mxu0 }
 0x494   : > { %v3336_v40 = vadd.f32 %v3919_v34, %v3864_v32  ;;  %v3922_v41 = vadd.f32 %v3921_v39, %v3920_v36  ;;  %v3943_v42 = vpop.f32.mrb[3].mxu1 }
 0x495   : > { %v3944_v43 = vadd.f32 %v3943_v42, %v3942_v38 }
 0x496   : > { %v3377_v44 = vadd.f32 %v3941_v37, %v3336_v40  ;;  %v3339_v45 = vadd.f32 %v3922_v41, %v3864_v32 }
 0x498   : > { %3383 = vst [vmem:[#allocation9] sm:$0xff] %v3377_v44  ;;  %v3380_v46 = vadd.f32 %v3944_v43, %v3339_v45 }
 0x49a   : > { %3384 = vst [vmem:[#allocation9 + $0x8] sm:$0xff] %v3380_v46 }
 0x49b PF: > { %p4023_p3 = scmp.eq.s32.totalorder %s4803_s21, 2  ;;  %s4764_s17 = smov [#allocation9]  }
 0x49c   : > { %s3391_s19 = sshll.u32 %s4764_s17, 4  ;;  %s3392_s19 = int_to_ptr.vmem [resolvable:$true] %s3391_s19 }
 0x49d   : > { %s4696_s23 = scalar_lea.vmem %s3392_s19, 256  ;;  %p4703_p13 = scmp.lt.s32.totalorder %s3392_s19, %s3392_s19 }
 0x49e   : > { %p4697_p10 = scmp.ne.s32.totalorder %s3392_s19, %s4696_s23  ;;  %p4704_p4 = scmp.lt.s32.totalorder %s4696_s23, %s4696_s23 }
 0x4a0   : > { %p4698_p6 = pnand %p4697_p10, %p4023_p3  ;;  %p4705_p0 = por %p4704_p4, %p4703_p13 }
 0x4a2   : > { %p4699_p12 = pneg %p4698_p6 }
 0x4a4   : > { %p4706_p8 = pnand %p4705_p0, %p4699_p12 }
 0x4a6   : > { %4709 = shalt.err (!%p4706_p8)
}
 0x4a7   : > { %s4710_s26 = scalar_lea.hbm %s4977_s5, 256 }
 0x4a8   : > { %p4711_p7 = scmp.ne.s32.totalorder %s4977_s5, %s4710_s26  ;;  %p4716_p9 = scmp.lt.u32.totalorder %s4710_s26, %s4977_s5 }
 0x4aa   : > { %p4712_p2 = pnand %p4711_p7, %p4023_p3 }
 0x4ac   : > { %p4713_p5 = pneg %p4712_p2 }
 0x4ae   : > { %p4718_p11 = pnand %p4716_p9, %p4713_p5 }
 0x4b0   : > { %4721 = shalt.err (!%p4718_p11)
}
 0x4b1   : > { %s4765_s6 = smov 128   ;;  %s4766_s7 = smov 8  }
 0x4b2   : > { %4004 = dma.vmem_to_hbm [thread:$0]  (%p4023_p3), %s3392_s19, 256, %s4977_s5, [#allocation5], %s4765_s6, %s4765_s6, %s4766_s7  }
 0x4b3   : > { %4741 = dma.done.wait (%p4023_p3), [#allocation5], 256  }
 0x4b4   : > { %4743 = vsyncadd (%p4023_p3), [#allocation5], 4294967040 }
 0x4b5 PF: > { %s20_s18 = sadd.s32 1, %s4746_s18  }
 0x4b6   : > { %p17_p1 = scmp.ge.s32.totalorder %s20_s18, 5  }
 0x4b8   :  { %19 = sbr.rel (!%p17_p1) target bundleno = 4 (0x4), region = 103 }
 0x4bf   :  { %3407 = vsyncpa [#allocation4], 1 }
 0x4c0   :  { %3409 = vsyncpa [#allocation4 + $0x1], 1 }
 0x4c1   :  { %3410 = vsyncpa [#allocation7], 1 }
 0x4c2   :  { %3412 = vsyncpa [#allocation7 + $0x1], 1 }
 0x4c3   :  { %3413 = vsyncpa [#allocation5], 1 }
 0x4c4   :  { %3415 = vsyncpa [#allocation5 + $0x1], 1 }

</bundles_post_ra>
